<compile_context>
chip_gen: v7x
topology: tpu7x:2x2x1
jax: 0.10.0
libtpu: 0.0.40
codegen_flags: <defaults>
</compile_context>

<pallas_src>
import functools

import jax
import jax.numpy as jnp
from jax.experimental import pallas as pl
from jax.experimental.pallas import tpu as pltpu


# ---- packed parameter layout: one (192, 128) f32 buffer, 8-row aligned blocks ----
#   rows   0:4,    cols 0:32   -> W1  (4, 32)
#   row    8,      cols 0:32   -> b1  (1, 32)
#   rows  16:48,   cols 0:128  -> W2  (32, H) zero-padded to 128 cols
#   row   48,      cols 0:128  -> b2  (1, H)  zero-padded
#   rows  56:184,  cols 0:128  -> W3  (H, A)  zero-padded to (128, 128)
#   row  184,      cols 0:128  -> b3  (1, A)  zero-padded
_PACK_ROWS = 192
_PACK_COLS = 128
_IN = 4          # input_state
_H1 = 32         # fc1 output width
_H_MAX = 128     # max supported hidden_layer_size (lane-padded)
_A_MAX = 128     # max supported num_actions


def _mlp_kernel(x_ref, p_ref, out_ref):
    """One batch tile of the 3-layer MLP; all parameters come from one packed ref."""
    x = x_ref[...]                                   # (TB, 4) f32

    # --- fc1 (4 -> 32): K=4 is <4% of the MXU contraction dim; do 4 VPU FMAs ---
    w1 = p_ref[0:4, 0:_H1]                           # (4, 32)
    b1 = p_ref[8:9, 0:_H1]                           # (1, 32)
    h1 = (x[:, 0:1] * w1[0:1, :]
          + x[:, 1:2] * w1[1:2, :]
          + x[:, 2:3] * w1[2:3, :]
          + x[:, 3:4] * w1[3:4, :]
          + b1)
    h1 = jnp.maximum(h1, 0.0)                        # (TB, 32)

    # --- fc2 (32 -> H, lane-padded to 128): full-lane, 8-row-aligned reads ---
    # Padded cols of W2/b2 are exactly 0 -> padded cols of h2 stay exactly 0.
    w2 = p_ref[16:48, :]                             # (32, 128)
    b2 = p_ref[48:49, :]                             # (1, 128)
    h2 = jnp.dot(h1, w2, preferred_element_type=jnp.float32) + b2
    h2 = jnp.maximum(h2, 0.0)                        # (TB, 128)

    # --- fc3 (H -> A): padded rows/cols of W3/b3 are 0 -> extra lanes add 0 ---
    w3 = p_ref[56:184, :]                            # (128, 128)
    b3 = p_ref[184:185, :]                           # (1, 128)
    q = jnp.dot(h2, w3, preferred_element_type=jnp.float32) + b3   # (TB, 128)

    # Store only the real action columns (masked vst on A lanes beats a separate
    # XLA slice dispatch at this problem size).
    a = out_ref.shape[-1]
    out_ref[...] = q[:, :a].astype(out_ref.dtype)


def _round_up(x, m):
    return ((x + m - 1) // m) * m


def pack_params(params):
    """Pack the 6 logical weight/bias arrays into one zero-padded (192,128) buffer."""
    w1, b1 = params["w1"], params["b1"]              # (4,32), (1,32)
    w2, b2 = params["w2"], params["b2"]              # (32,H), (1,H)
    w3, b3 = params["w3"], params["b3"]              # (H,A),  (1,A)
    H = w2.shape[1]
    A = w3.shape[1]
    assert w1.shape == (_IN, _H1) and b1.shape == (1, _H1)
    assert w2.shape[0] == _H1 and b2.shape == (1, H)
    assert w3.shape[0] == H and b3.shape == (1, A)
    assert H <= _H_MAX and A <= _A_MAX

    p = jnp.zeros((_PACK_ROWS, _PACK_COLS), jnp.float32)
    p = p.at[0:4, 0:_H1].set(w1.astype(jnp.float32))
    p = p.at[8:9, 0:_H1].set(b1.astype(jnp.float32))
    p = p.at[16:48, 0:H].set(w2.astype(jnp.float32))
    p = p.at[48:49, 0:H].set(b2.astype(jnp.float32))
    p = p.at[56:56 + H, 0:A].set(w3.astype(jnp.float32))
    p = p.at[184:185, 0:A].set(b3.astype(jnp.float32))
    return p


def net_forward(states, packed_params, num_actions, batch_tile=2048):
    """Forward pass of `Net` as one Pallas kernel tiled over the batch.

    states:        (B, 4) float32
    packed_params: (192, 128) float32 from pack_params()
    returns:       (B, num_actions) float32 q-values
    """
    B, F = states.shape
    assert F == _IN
    assert packed_params.shape == (_PACK_ROWS, _PACK_COLS)
    assert 1 <= num_actions <= _A_MAX

    # ---- batch-tile / grid selection --------------------------------------
    # A grid step costs ~0.35us of pipeline overhead, comparable to this MLP's
    # entire per-tile compute, and v5e/v6e have a single TensorCore.  So:
    # use ONE grid step whenever the (8-row padded) batch fits in the requested
    # tile; only split into multiple "parallel" tiles (megacore on v7x) when
    # the batch is large enough to carry real work per tile.
    bt = _round_up(max(int(batch_tile), 8), 8)       # (8,128) rule: rows % 8 == 0
    b_pad8 = _round_up(B, 8)
    tb = b_pad8 if b_pad8 <= bt else bt
    b_pad = _round_up(B, tb)
    # Per-tile VMEM (double-buffered x + out + 96 KiB params + temporaries) is
    # well under the default scoped limit for tb<=2048; no vmem_limit override.

    x = states if b_pad == B else jnp.pad(states, ((0, b_pad - B), (0, 0)))

    grid = (b_pad // tb,)

    q = pl.pallas_call(
        _mlp_kernel,
        out_shape=jax.ShapeDtypeStruct((b_pad, num_actions), jnp.float32),
        grid=grid,
        in_specs=[
            # batch-tiled states: (tb, 4); lane dim equals full array dim (4)
            pl.BlockSpec((tb, _IN), lambda i: (i, 0)),
            # packed params: constant block index -> VMEM-resident across tiles
            pl.BlockSpec((_PACK_ROWS, _PACK_COLS), lambda i: (0, 0)),
        ],
        # block last dim == full array dim (num_actions) -> legal; no wrapper slice
        out_specs=pl.BlockSpec((tb, num_actions), lambda i: (i, 0)),
        compiler_params=pltpu.CompilerParams(
            dimension_semantics=("parallel",)),
    )(x, packed_params)

    # Padded batch rows (zero inputs) produce relu(bias) garbage; drop them.
    return q if b_pad == B else q[:B]


def init_params(key, num_actions=2, hidden_layer_size=50):
    """Deterministic synthetic parameters matching Net.__init__ shapes.

    PyTorch Linear weights are (out, in); we store them transposed as (in, out).
    """
    input_state = _IN
    k1, k2, k3, k4, k5, k6 = jax.random.split(key, 6)

    def uinit(k, shape, fan_in):
        bound = 1.0 / jnp.sqrt(fan_in)
        return jax.random.uniform(k, shape, jnp.float32, -bound, bound)

    return {
        "w1": uinit(k1, (input_state, _H1), input_state),
        "b1": uinit(k2, (1, _H1), input_state),
        "w2": uinit(k3, (_H1, hidden_layer_size), _H1),
        "b2": uinit(k4, (1, hidden_layer_size), _H1),
        "w3": uinit(k5, (hidden_layer_size, num_actions), hidden_layer_size),
        "b3": uinit(k6, (1, num_actions), hidden_layer_size),
    }


def _jax_reference(states, params):
    h1 = jnp.maximum(states @ params["w1"] + params["b1"], 0.0)
    h2 = jnp.maximum(h1 @ params["w2"] + params["b2"], 0.0)
    return h2 @ params["w3"] + params["b3"]


if __name__ == "__main__":
    key = jax.random.PRNGKey(0)
    k_params, k_states, k_ragged = jax.random.split(key, 3)

    num_actions = 2
    hidden_layer_size = 50
    batch = 256   # fits one batch tile -> grid=(1,), no pad/slice dispatches

    params = init_params(k_params, num_actions, hidden_layer_size)
    packed = pack_params(params)
    states = jax.random.normal(k_states, (batch, 4), jnp.float32)

    q_fn = jax.jit(functools.partial(net_forward, num_actions=num_actions))

    # Main check: single-tile path.
    q_values = q_fn(states, packed)
    jax.block_until_ready(q_values)
    q_ref = _jax_reference(states, params)
    assert q_values.shape == (batch, num_actions)
    assert jnp.allclose(q_values, q_ref, atol=1e-4, rtol=1e-4)

    # Ragged-batch check: exercises the pad / row-slice fallback path.
    states_r = jax.random.normal(k_ragged, (37, 4), jnp.float32)
    q_r = q_fn(states_r, packed)
    jax.block_until_ready(q_r)
    assert q_r.shape == (37, num_actions)
    assert jnp.allclose(q_r, _jax_reference(states_r, params), atol=1e-4, rtol=1e-4)

    # TODO(synk): in a real DQN loop, fuse the downstream consumer (argmax /
    # TD-target math, target-network forward) into this kernel's epilogue —
    # the remaining cost here is per-dispatch launch overhead, not compute.

    print("KERNEL_OK")
</pallas_src>

<mosaic_0001>
module attributes {stable_mosaic.version = 11 : i64} {
  func.func @_mlp_kernel(%arg0: i32, %arg1: memref<256x4xf32, #tpu.memory_space<vmem>>, %arg2: memref<192x128xf32, #tpu.memory_space<vmem>>, %arg3: memref<256x2xf32, #tpu.memory_space<vmem>>) attributes {dimension_semantics = [#tpu.dimension_semantics<parallel>], iteration_bounds = array<i64: 1>, scalar_prefetch = 0 : i64, scratch_operands = 0 : i64, tpu.core_type = #tpu.core_type<tc>, window_params = [{transform_indices = @transform_0, window_bounds = array<i64: 256, 4>}, {pipeline_mode = #tpu.pipeline_mode<synchronous>, transform_indices = @transform_1, window_bounds = array<i64: 192, 128>}, {transform_indices = @transform_2, window_bounds = array<i64: 256, 2>}]} {
    %c0 = arith.constant 0 : index
    %c0_0 = arith.constant 0 : index
    %0 = vector.load %arg1[%c0, %c0_0] : memref<256x4xf32, #tpu.memory_space<vmem>>, vector<256x4xf32>
    %c0_1 = arith.constant 0 : index
    %c0_2 = arith.constant 0 : index
    %1 = vector.load %arg2[%c0_1, %c0_2] : memref<192x128xf32, #tpu.memory_space<vmem>>, vector<4x32xf32>
    %c8 = arith.constant 8 : index
    %c0_3 = arith.constant 0 : index
    %2 = vector.load %arg2[%c8, %c0_3] : memref<192x128xf32, #tpu.memory_space<vmem>>, vector<1x32xf32>
    %3 = vector.extract_strided_slice %0 {offsets = [0, 0], sizes = [256, 1], strides = [1, 1]} : vector<256x4xf32> to vector<256x1xf32>
    %4 = vector.extract_strided_slice %1 {offsets = [0, 0], sizes = [1, 32], strides = [1, 1]} : vector<4x32xf32> to vector<1x32xf32>
    %5 = vector.broadcast %3 : vector<256x1xf32> to vector<256x32xf32>
    %6 = vector.broadcast %4 : vector<1x32xf32> to vector<256x32xf32>
    %7 = arith.mulf %5, %6 : vector<256x32xf32>
    %8 = vector.extract_strided_slice %0 {offsets = [0, 1], sizes = [256, 1], strides = [1, 1]} : vector<256x4xf32> to vector<256x1xf32>
    %9 = vector.extract_strided_slice %1 {offsets = [1, 0], sizes = [1, 32], strides = [1, 1]} : vector<4x32xf32> to vector<1x32xf32>
    %10 = vector.broadcast %8 : vector<256x1xf32> to vector<256x32xf32>
    %11 = vector.broadcast %9 : vector<1x32xf32> to vector<256x32xf32>
    %12 = arith.mulf %10, %11 : vector<256x32xf32>
    %13 = arith.addf %7, %12 : vector<256x32xf32>
    %14 = vector.extract_strided_slice %0 {offsets = [0, 2], sizes = [256, 1], strides = [1, 1]} : vector<256x4xf32> to vector<256x1xf32>
    %15 = vector.extract_strided_slice %1 {offsets = [2, 0], sizes = [1, 32], strides = [1, 1]} : vector<4x32xf32> to vector<1x32xf32>
    %16 = vector.broadcast %14 : vector<256x1xf32> to vector<256x32xf32>
    %17 = vector.broadcast %15 : vector<1x32xf32> to vector<256x32xf32>
    %18 = arith.mulf %16, %17 : vector<256x32xf32>
    %19 = arith.addf %13, %18 : vector<256x32xf32>
    %20 = vector.extract_strided_slice %0 {offsets = [0, 3], sizes = [256, 1], strides = [1, 1]} : vector<256x4xf32> to vector<256x1xf32>
    %21 = vector.extract_strided_slice %1 {offsets = [3, 0], sizes = [1, 32], strides = [1, 1]} : vector<4x32xf32> to vector<1x32xf32>
    %22 = vector.broadcast %20 : vector<256x1xf32> to vector<256x32xf32>
    %23 = vector.broadcast %21 : vector<1x32xf32> to vector<256x32xf32>
    %24 = arith.mulf %22, %23 : vector<256x32xf32>
    %25 = arith.addf %19, %24 : vector<256x32xf32>
    %26 = vector.broadcast %2 : vector<1x32xf32> to vector<256x32xf32>
    %27 = arith.addf %25, %26 : vector<256x32xf32>
    %cst = arith.constant 0.000000e+00 : f32
    %28 = vector.broadcast %cst : f32 to vector<256x32xf32>
    %29 = arith.maximumf %27, %28 : vector<256x32xf32>
    %c16 = arith.constant 16 : index
    %c0_4 = arith.constant 0 : index
    %30 = vector.load %arg2[%c16, %c0_4] : memref<192x128xf32, #tpu.memory_space<vmem>>, vector<32x128xf32>
    %c48 = arith.constant 48 : index
    %c0_5 = arith.constant 0 : index
    %31 = vector.load %arg2[%c48, %c0_5] : memref<192x128xf32, #tpu.memory_space<vmem>>, vector<1x128xf32>
    %cst_6 = arith.constant dense<0.000000e+00> : vector<256x128xf32>
    %32 = tpu.matmul %29, %30, %cst_6 {dimension_numbers = #tpu.dot_dimension_numbers<[1], [0], [0], [1], [0, 0, 1, 1], [], []>} : vector<256x32xf32>, vector<32x128xf32>, vector<256x128xf32> -> vector<256x128xf32>
    %33 = vector.broadcast %31 : vector<1x128xf32> to vector<256x128xf32>
    %34 = arith.addf %32, %33 : vector<256x128xf32>
    %cst_7 = arith.constant 0.000000e+00 : f32
    %35 = vector.broadcast %cst_7 : f32 to vector<256x128xf32>
    %36 = arith.maximumf %34, %35 : vector<256x128xf32>
    %c56 = arith.constant 56 : index
    %c0_8 = arith.constant 0 : index
    %37 = vector.load %arg2[%c56, %c0_8] : memref<192x128xf32, #tpu.memory_space<vmem>>, vector<128x128xf32>
    %c184 = arith.constant 184 : index
    %c0_9 = arith.constant 0 : index
    %38 = vector.load %arg2[%c184, %c0_9] : memref<192x128xf32, #tpu.memory_space<vmem>>, vector<1x128xf32>
    %cst_10 = arith.constant dense<0.000000e+00> : vector<256x128xf32>
    %39 = tpu.matmul %36, %37, %cst_10 {dimension_numbers = #tpu.dot_dimension_numbers<[1], [0], [0], [1], [0, 0, 1, 1], [], []>} : vector<256x128xf32>, vector<128x128xf32>, vector<256x128xf32> -> vector<256x128xf32>
    %40 = vector.broadcast %38 : vector<1x128xf32> to vector<256x128xf32>
    %41 = arith.addf %39, %40 : vector<256x128xf32>
    %42 = vector.extract_strided_slice %41 {offsets = [0, 0], sizes = [256, 2], strides = [1, 1]} : vector<256x128xf32> to vector<256x2xf32>
    %c0_11 = arith.constant 0 : index
    %c0_12 = arith.constant 0 : index
    %43 = vector.load %arg3[%c0_11, %c0_12] : memref<256x2xf32, #tpu.memory_space<vmem>>, vector<256x2xf32>
    tpu.vector_store %arg3[%c0_11, %c0_12], %42 {strides = array<i32>} : memref<256x2xf32, #tpu.memory_space<vmem>>, vector<256x2xf32>,
    return
  }
  func.func @transform_0(%arg0: i32) -> (i32, i32) {
    %c0_i32 = arith.constant 0 : i32
    %c0_i32_0 = arith.constant 0 : i32
    return %arg0, %c0_i32 : i32, i32
  }
  func.func @transform_1(%arg0: i32) -> (i32, i32) {
    %c0_i32 = arith.constant 0 : i32
    %c0_i32_0 = arith.constant 0 : i32
    %c0_i32_1 = arith.constant 0 : i32
    return %c0_i32, %c0_i32_0 : i32, i32
  }
  func.func @transform_2(%arg0: i32) -> (i32, i32) {
    %c0_i32 = arith.constant 0 : i32
    %c0_i32_0 = arith.constant 0 : i32
    return %arg0, %c0_i32 : i32, i32
  }
}

</mosaic_0001>

<bundles_post_ra>
// kernel: net_forward.1
= control target key start
LH: loop header
LB: loop body
LE: loop exit
PB: predicated region body
PF: predicated region fallthrough
CT: control target
= control target key end

     0   :  { %v2959_v0 = vmov 0   ;;  %v2963_v3 = vmov 1   ;;  %v2957_v4 = vmov 2   ;;  %v2956_v5 = vmov 3   ;;  %s2953_s0 = inlined_call_operand.vmem [shape: f32[256,4], index: 0, kind: input, shape index: {}]   ;;  %s2954_s1 = inlined_call_operand.vmem [shape: f32[192,128], index: 1, kind: input, shape index: {}]   ;;  %s2955_s2 = inlined_call_operand.vmem [shape: f32[256,2], index: 2, kind: output, shape index: {}]  }
   0x1   :  { %1860 = vset.pattern.permute.xlu1 %v2959_v0  ;;  %1858 = vset.pattern.permute.xlu0 %v2959_v0  ;;  %v1967_v1 = vld [vmem:[%s2953_s0 + $0x8] sm:$0xff]  ;;  %v11_v2 = vld [vmem:[%s2953_s0] sm:$0xff]  ;;  %v13_v6 = vld [vmem:[%s2953_s0 + $0x10] sm:$0xff]  ;;  %v205_v32 = vlaneseq  ;;  %vm906_vm0 = vcmask 261120   ;;  %vm1506_vm1 = vcmask 15360  }
   0x2   :  { %52 = vperm.xlu1 %1860, %v1967_v1   ;;  %47 = vperm.xlu0 %1858, %v11_v2   ;;  %v1987_v7 = vld [vmem:[%s2953_s0 + $0x18] sm:$0xff]  ;;  %v15_v8 = vld [vmem:[%s2953_s0 + $0x20] sm:$0xff]  ;;  %v1998_v9 = vld [vmem:[%s2953_s0 + $0x28] sm:$0xff] }
   0x3   :  { %v17_v10 = vld [vmem:[%s2953_s0 + $0x30] sm:$0xff]  ;;  %v2010_v11 = vld [vmem:[%s2953_s0 + $0x38] sm:$0xff]  ;;  %v19_v12 = vld [vmem:[%s2953_s0 + $0x40] sm:$0xff]  ;;  %v206_v34 = vshrl.u32 %v205_v32, 7 }
   0x4   :  { %v2020_v13 = vld [vmem:[%s2953_s0 + $0x48] sm:$0xff]  ;;  %v2027_v14 = vld [vmem:[%s2953_s0 + $0x50] sm:$0xff]  ;;  %v2035_v15 = vld [vmem:[%s2953_s0 + $0x58] sm:$0xff] }
   0x5   :  { %v2043_v16 = vld [vmem:[%s2953_s0 + $0x60] sm:$0xff]  ;;  %v2050_v17 = vld [vmem:[%s2953_s0 + $0x68] sm:$0xff]  ;;  %v2056_v18 = vld [vmem:[%s2953_s0 + $0x70] sm:$0xff]  ;;  %v207_v36 = vsub.s32 0, %v206_v34  ;;  %v371_v40 = vsub.s32 1, %v206_v34  ;;  %v567_v42 = vsub.s32 2, %v206_v34 }
   0x6   :  { %1861 = vset.pattern.permute.xlu1 %v2963_v3  ;;  %1859 = vset.pattern.permute.xlu0 %v2963_v3  ;;  %v2063_v19 = vld [vmem:[%s2953_s0 + $0x78] sm:$0xff]  ;;  %v2070_v20 = vld [vmem:[%s2953_s0 + $0x80] sm:$0xff]  ;;  %v2078_v21 = vld [vmem:[%s2953_s0 + $0x88] sm:$0xff]  ;;  %v763_v43 = vsub.s32 3, %v206_v34 }
   0x7   :  { %246 = vperm.xlu1 %1861, %v1967_v1   ;;  %242 = vperm.xlu0 %1859, %v11_v2   ;;  %v2085_v22 = vld [vmem:[%s2953_s0 + $0x90] sm:$0xff]  ;;  %v2092_v23 = vld [vmem:[%s2953_s0 + $0x98] sm:$0xff]  ;;  %v2099_v24 = vld [vmem:[%s2953_s0 + $0xa0] sm:$0xff] }
   0x8   :  { %v2106_v25 = vld [vmem:[%s2953_s0 + $0xa8] sm:$0xff]  ;;  %v2113_v26 = vld [vmem:[%s2953_s0 + $0xb0] sm:$0xff]  ;;  %v2120_v27 = vld [vmem:[%s2953_s0 + $0xb8] sm:$0xff] }
   0x9   :  { %v2127_v28 = vld [vmem:[%s2953_s0 + $0xc0] sm:$0xff]  ;;  %v2135_v29 = vld [vmem:[%s2953_s0 + $0xc8] sm:$0xff]  ;;  %v2142_v30 = vld [vmem:[%s2953_s0 + $0xd0] sm:$0xff] }
   0xa   :  { %v2150_v31 = vld [vmem:[%s2953_s0 + $0xd8] sm:$0xff]  ;;  %v2157_v33 = vld [vmem:[%s2953_s0 + $0xe0] sm:$0xff]  ;;  %v2164_v35 = vld [vmem:[%s2953_s0 + $0xe8] sm:$0xff] }
   0xb   :  { %1862 = vset.pattern.permute.xlu1 %v2957_v4  ;;  %1865 = vset.pattern.permute.xlu0 %v2956_v5  ;;  %2969 = vst [vmem:[#allocation2_spill] sm:$0xff] %v2157_v33  ;;  %2970 = vst [vmem:[#allocation3_spill] sm:$0xff] %v2164_v35  ;;  %v43_v37 = vld [vmem:[%s2954_s1] sm:$0xf]  ;;  %v897_v44 = vld [vmem:[%s2954_s1 + $0x10] sm:$0xff] }
   0xc   :  { %438 = vperm.xlu1 %1862, %v11_v2   ;;  %634 = vperm.xlu0 %1865, %v11_v2   ;;  %v2175_v41 = vrot.slane %v43_v37, %v207_v36  ;;  %v898_v45 = vld [vmem:[%s2954_s1 + $0x18] sm:$0xff]  ;;  %v2186_v46 = vrot.slane %v43_v37, %v371_v40  ;;  %v2193_v52 = vrot.slane %v43_v37, %v567_v42  ;;  %v899_v54 = vld [vmem:[%s2954_s1 + $0x20] sm:$0xff]  ;;  %v900_v55 = vld [vmem:[%s2954_s1 + $0x28] sm:$0xff] }
   0xd   :  { %v1798_v47 = vpack.c.bf16 %v898_v45, %v897_v44  ;;  %v2195_v53 = vrot.slane %v43_v37, %v763_v43  ;;  %v1802_v56 = vpack.c.bf16 %v900_v55, %v899_v54 }
   0xf   :  { %1799 = vmatprep.subr.bf16.mxu0 %v1798_v47 }
  0x10   :  { %1863 = vset.pattern.permute.xlu1 %v2959_v0  ;;  %638 = vperm.xlu0 %1865, %v1967_v1  }
  0x11   :  { %57 = vperm.xlu1 %1863, %v13_v6   ;;  %1801 = vmatpush3.bf16.msra.mxu0 %v1798_v47 }
  0x12   :  { %1803 = vmatprep.subr.bf16.mxu0 %v1802_v56 }
  0x14   :  { %642 = vperm.xlu0 %1865, %v13_v6  }
  0x15   :  { %1864 = vset.pattern.permute.xlu1 %v2963_v3  ;;  %1805 = vmatpush3.bf16.msra.mxu0 %v1802_v56  ;;  %v2314_v56 = vld [vmem:[%s2953_s0 + $0xf8] sm:$0xff] }
  0x16   :  { %250 = vperm.xlu1 %1864, %v13_v6   ;;  %2972 = vst [vmem:[#allocation5_spill] sm:$0xff] %v2314_v56 }
  0x18   :  { %646 = vperm.xlu0 %1865, %v1987_v7  }
  0x1a   :  { %1866 = vset.pattern.permute.xlu1 %v2959_v0 }
  0x1b   :  { %62 = vperm.xlu1 %1866, %v1987_v7  }
  0x1c   :  { %650 = vperm.xlu0 %1865, %v15_v8  }
  0x1f   :  { %1867 = vset.pattern.permute.xlu1 %v2963_v3 }
  0x20   :  { %254 = vperm.xlu1 %1867, %v1987_v7   ;;  %654 = vperm.xlu0 %1865, %v1998_v9  }
  0x24   :  { %1868 = vset.pattern.permute.xlu1 %v2957_v4  ;;  %658 = vperm.xlu0 %1865, %v17_v10  }
  0x25   :  { %446 = vperm.xlu1 %1868, %v13_v6  }
  0x28   :  { %662 = vperm.xlu0 %1865, %v2010_v11  }
  0x29   :  { %1869 = vset.pattern.permute.xlu1 %v2959_v0 }
  0x2a   :  { %67 = vperm.xlu1 %1869, %v15_v8  }
  0x2c   :  { %666 = vperm.xlu0 %1865, %v19_v12  }
  0x2e   :  { %1870 = vset.pattern.permute.xlu1 %v2963_v3 }
  0x2f   :  { %258 = vperm.xlu1 %1870, %v15_v8  }
  0x30   :  { %670 = vperm.xlu0 %1865, %v2020_v13  }
  0x33   :  { %1871 = vset.pattern.permute.xlu1 %v2959_v0 }
  0x34   :  { %72 = vperm.xlu1 %1871, %v1998_v9   ;;  %674 = vperm.xlu0 %1865, %v2027_v14  }
  0x38   :  { %1872 = vset.pattern.permute.xlu1 %v2963_v3  ;;  %678 = vperm.xlu0 %1865, %v2035_v15  }
  0x39   :  { %262 = vperm.xlu1 %1872, %v1998_v9  }
  0x3c   :  { %682 = vperm.xlu0 %1865, %v2043_v16  }
  0x3d   :  { %1873 = vset.pattern.permute.xlu1 %v2957_v4 }
  0x3e   :  { %454 = vperm.xlu1 %1873, %v15_v8  }
  0x40   :  { %686 = vperm.xlu0 %1865, %v2050_v17  }
  0x42   :  { %1874 = vset.pattern.permute.xlu1 %v2959_v0 }
  0x43   :  { %77 = vperm.xlu1 %1874, %v17_v10  }
  0x44   :  { %690 = vperm.xlu0 %1865, %v2056_v18  }
  0x47   :  { %1875 = vset.pattern.permute.xlu1 %v2963_v3 }
  0x48   :  { %266 = vperm.xlu1 %1875, %v17_v10   ;;  %694 = vperm.xlu0 %1865, %v2063_v19  }
  0x4c   :  { %1876 = vset.pattern.permute.xlu1 %v2959_v0  ;;  %698 = vperm.xlu0 %1865, %v2070_v20  }
  0x4d   :  { %82 = vperm.xlu1 %1876, %v2010_v11  }
  0x50   :  { %702 = vperm.xlu0 %1865, %v2078_v21  }
  0x51   :  { %1877 = vset.pattern.permute.xlu1 %v2963_v3 }
  0x52   :  { %270 = vperm.xlu1 %1877, %v2010_v11  }
  0x54   :  { %706 = vperm.xlu0 %1865, %v2085_v22  }
  0x56   :  { %1878 = vset.pattern.permute.xlu1 %v2957_v4 }
  0x57   :  { %462 = vperm.xlu1 %1878, %v17_v10  }
  0x58   :  { %710 = vperm.xlu0 %1865, %v2092_v23  }
  0x5b   :  { %1879 = vset.pattern.permute.xlu1 %v2959_v0 }
  0x5c   :  { %87 = vperm.xlu1 %1879, %v19_v12   ;;  %714 = vperm.xlu0 %1865, %v2099_v24  }
  0x60   :  { %1880 = vset.pattern.permute.xlu1 %v2963_v3  ;;  %718 = vperm.xlu0 %1865, %v2106_v25  }
  0x61   :  { %274 = vperm.xlu1 %1880, %v19_v12  }
  0x64   :  { %722 = vperm.xlu0 %1865, %v2113_v26  }
  0x65   :  { %1881 = vset.pattern.permute.xlu1 %v2959_v0 }
  0x66   :  { %92 = vperm.xlu1 %1881, %v2020_v13  }
  0x68   :  { %726 = vperm.xlu0 %1865, %v2120_v27  }
  0x6a   :  { %1882 = vset.pattern.permute.xlu1 %v2963_v3 }
  0x6b   :  { %278 = vperm.xlu1 %1882, %v2020_v13  }
  0x6c   :  { %730 = vperm.xlu0 %1865, %v2127_v28  }
  0x6f   :  { %1883 = vset.pattern.permute.xlu1 %v2957_v4 }
  0x70   :  { %470 = vperm.xlu1 %1883, %v19_v12   ;;  %734 = vperm.xlu0 %1865, %v2135_v29  }
  0x74   :  { %1884 = vset.pattern.permute.xlu1 %v2959_v0  ;;  %738 = vperm.xlu0 %1865, %v2142_v30  }
  0x75   :  { %97 = vperm.xlu1 %1884, %v2027_v14  }
  0x78   :  { %742 = vperm.xlu0 %1865, %v2150_v31  }
  0x79   :  { %1885 = vset.pattern.permute.xlu1 %v2963_v3 }
  0x7a   :  { %282 = vperm.xlu1 %1885, %v2027_v14  }
  0x7c   :  { %746 = vperm.xlu0 %1865, %v2157_v33  }
  0x7e   :  { %1886 = vset.pattern.permute.xlu1 %v2959_v0 }
  0x7f   :  { %102 = vperm.xlu1 %1886, %v2035_v15  }
  0x80   :  { %750 = vperm.xlu0 %1865, %v2164_v35  }
  0x81   :  { %v2172_v38 = vpop.permute.xlu1 %52  ;;  %v48_v39 = vpop.permute.xlu0 %47 }
  0x82   :  { %v209_v48 = vmul.f32 %v2175_v41, %v48_v39 }
  0x83   :  { %1887 = vset.pattern.permute.xlu1 %v2963_v3 }
  0x84   :  { %286 = vperm.xlu1 %1887, %v2035_v15   ;;  %1938 = vset.pattern.permute.xlu0 %v2957_v4 }
  0x85   :  { %442 = vperm.xlu0 %1938, %v1967_v1   ;;  %v2215_v1 = vld [vmem:[%s2954_s1 + $0x8] ss:$0 sm:$0xff] }
  0x86   :  { %v2189_v49 = vpop.permute.xlu1 %246  ;;  %v243_v50 = vpop.permute.xlu0 %242 }
  0x87   :  { %v373_v51 = vmul.f32 %v2186_v46, %v243_v50 }
  0x88   :  { %1888 = vset.pattern.permute.xlu1 %v2957_v4 }
  0x89   :  { %478 = vperm.xlu1 %1888, %v2027_v14   ;;  %450 = vperm.xlu0 %1938, %v1987_v7   ;;  %v405_v57 = vadd.f32 %v373_v51, %v209_v48 }
  0x8b   :  { %v439_v58 = vpop.permute.xlu1 %438  ;;  %v635_v59 = vpop.permute.xlu0 %634 }
  0x8c   :  { %v569_v60 = vmul.f32 %v2193_v52, %v439_v58  ;;  %v765_v61 = vmul.f32 %v2195_v53, %v635_v59 }
  0x8d   :  { %1889 = vset.pattern.permute.xlu1 %v2959_v0  ;;  %458 = vperm.xlu0 %1938, %v1998_v9  }
  0x8e   :  { %v601_v62 = vadd.f32 %v569_v60, %v405_v57  ;;  %107 = vperm.xlu1 %1889, %v2043_v16  }
  0x8f   :  { %v2210_v63 = vpop.permute.xlu0 %638 }
  0x90   :  { %v797_v2 = vadd.f32 %v765_v61, %v601_v62  ;;  %v2217_v6 = vpop.permute.xlu1 %57 }
  0x91   :  { %466 = vperm.xlu0 %1938, %v2010_v11  }
  0x92   :  { %1890 = vset.pattern.permute.xlu1 %v2963_v3  ;;  %v833_v7 = vadd.f32 %v2215_v1, %v797_v2 }
  0x93   :  { %290 = vperm.xlu1 %1890, %v2043_v16   ;;  %v2223_v8 = vpop.permute.xlu0 %642 }
  0x94   :  { %v865_v9 = vmax.f32 %v833_v7, 0.0 }
  0x95   :  { %v2225_v10 = vpop.permute.xlu1 %250  ;;  %474 = vperm.xlu0 %1938, %v2020_v13  }
  0x96   :  { %1670 = vmatprep.mubr.msk.f32.mxu0 %vm906_vm0, %v865_v9 }
  0x97   :  { %1891 = vset.pattern.permute.xlu1 %v2959_v0  ;;  %v2230_v12 = vpop.permute.xlu0 %646 }
  0x98   :  { %112 = vperm.xlu1 %1891, %v2050_v17  }
  0x99   :  { %482 = vperm.xlu0 %1938, %v2035_v15  }
  0x9a   :  { %v2234_v11 = vpop.permute.xlu1 %62 }
  0x9b   :  { %v2236_v14 = vpop.permute.xlu0 %650 }
  0x9c   :  { %1892 = vset.pattern.permute.xlu1 %v2963_v3 }
  0x9d   :  { %294 = vperm.xlu1 %1892, %v2050_v17   ;;  %490 = vperm.xlu0 %1938, %v2050_v17  }
  0x9f   :  { %v2241_v13 = vpop.permute.xlu1 %254  ;;  %v2243_v32 = vpop.permute.xlu0 %654 }
  0xa1   :  { %1893 = vset.pattern.permute.xlu1 %v2957_v4  ;;  %498 = vperm.xlu0 %1938, %v2063_v19  }
  0xa2   :  { %486 = vperm.xlu1 %1893, %v2043_v16  }
  0xa3   :  { %v2248_v15 = vpop.permute.xlu0 %658 }
  0xa4   :  { %v2250_v34 = vpop.permute.xlu1 %446 }
  0xa5   :  { %506 = vperm.xlu0 %1938, %v2078_v21  }
  0xa6   :  { %1894 = vset.pattern.permute.xlu1 %v2959_v0 }
  0xa7   :  { %117 = vperm.xlu1 %1894, %v2056_v18   ;;  %v2255_v17 = vpop.permute.xlu0 %662 }
  0xa9   :  { %v2257_v36 = vpop.permute.xlu1 %67  ;;  %514 = vperm.xlu0 %1938, %v2092_v23  }
  0xab   :  { %1895 = vset.pattern.permute.xlu1 %v2963_v3  ;;  %v2261_v37 = vpop.permute.xlu0 %666 }
  0xac   :  { %298 = vperm.xlu1 %1895, %v2056_v18  }
  0xad   :  { %522 = vperm.xlu0 %1938, %v2106_v25  }
  0xae   :  { %v2265_v16 = vpop.permute.xlu1 %258 }
  0xaf   :  { %v2267_v39 = vpop.permute.xlu0 %670 }
  0xb0   :  { %1896 = vset.pattern.permute.xlu1 %v2959_v0 }
  0xb1   :  { %122 = vperm.xlu1 %1896, %v2063_v19   ;;  %530 = vperm.xlu0 %1938, %v2120_v27  }
  0xb3   :  { %v2272_v40 = vpop.permute.xlu1 %72  ;;  %v2274_v42 = vpop.permute.xlu0 %674 }
  0xb5   :  { %1897 = vset.pattern.permute.xlu1 %v2963_v3  ;;  %538 = vperm.xlu0 %1938, %v2135_v29  }
  0xb6   :  { %302 = vperm.xlu1 %1897, %v2063_v19  }
  0xb7   :  { %v2279_v43 = vpop.permute.xlu0 %678 }
  0xb8   :  { %v2281_v44 = vpop.permute.xlu1 %262 }
  0xb9   :  { %546 = vperm.xlu0 %1938, %v2150_v31  }
  0xba   :  { %1898 = vset.pattern.permute.xlu1 %v2957_v4 }
  0xbb   :  { %494 = vperm.xlu1 %1898, %v2056_v18   ;;  %v2286_v45 = vpop.permute.xlu0 %682 }
  0xbd   :  { %v2288_v47 = vpop.permute.xlu1 %454  ;;  %554 = vperm.xlu0 %1938, %v2164_v35  }
  0xbf   :  { %1899 = vset.pattern.permute.xlu1 %v2959_v0  ;;  %v2292_v48 = vpop.permute.xlu0 %686 }
  0xc0   :  { %127 = vperm.xlu1 %1899, %v2070_v20  }
  0xc1   :  { %562 = vperm.xlu0 %1938, %v2314_v56  }
  0xc2   :  { %v2295_v19 = vpop.permute.xlu1 %77 }
  0xc3   :  { %v2297_v50 = vpop.permute.xlu0 %690 }
  0xc4   :  { %1900 = vset.pattern.permute.xlu1 %v2963_v3 }
  0xc5   :  { %306 = vperm.xlu1 %1900, %v2070_v20   ;;  %1941 = vset.pattern.permute.xlu0 %v2956_v5 }
  0xc7   :  { %v2301_v18 = vpop.permute.xlu1 %266  ;;  %v2303_v51 = vpop.permute.xlu0 %694 }
  0xc9   :  { %1901 = vset.pattern.permute.xlu1 %v2959_v0 }
  0xca   :  { %132 = vperm.xlu1 %1901, %v2078_v21  }
  0xcb   :  { %v2307_v54 = vpop.permute.xlu0 %698 }
  0xcc   :  { %2971 = vst [vmem:[#allocation4_spill] sm:$0xff] %v2307_v54  ;;  %v2309_v55 = vpop.permute.xlu1 %82 }
  0xce   :  { %1902 = vset.pattern.permute.xlu1 %v2963_v3 }
  0xcf   :  { %310 = vperm.xlu1 %1902, %v2078_v21   ;;  %v2319_v57 = vpop.permute.xlu0 %702 }
  0xd0   :  { %2973 = vst [vmem:[#allocation6_spill] sm:$0xff] %v2319_v57 }
  0xd1   :  { %v2321_v58 = vpop.permute.xlu1 %270 }
  0xd3   :  { %1903 = vset.pattern.permute.xlu1 %v2957_v4  ;;  %v2325_v59 = vpop.permute.xlu0 %706 }
  0xd4   :  { %2974 = vst [vmem:[#allocation7_spill] sm:$0xff] %v2325_v59  ;;  %502 = vperm.xlu1 %1903, %v2070_v20  }
  0xd6   :  { %v2328_v60 = vpop.permute.xlu1 %462 }
  0xd7   :  { %v2330_v61 = vpop.permute.xlu0 %710 }
  0xd8   :  { %2975 = vst [vmem:[#allocation8_spill] sm:$0xff] %v2330_v61  ;;  %1904 = vset.pattern.permute.xlu1 %v2959_v0  ;;  %v571_v61 = vmul.f32 %v2193_v52, %v2250_v34  ;;  %v213_v34 = vmul.f32 %v2175_v41, %v2257_v36  ;;  %v769_v36 = vmul.f32 %v2195_v53, %v2236_v14 }
  0xd9   :  { %137 = vperm.xlu1 %1904, %v2085_v22   ;;  %v575_v14 = vmul.f32 %v2193_v52, %v2328_v60  ;;  %v772_v60 = vmul.f32 %v2195_v53, %v2255_v17 }
  0xdb   :  { %v2334_v21 = vpop.permute.xlu1 %87  ;;  %v2336_v62 = vpop.permute.xlu0 %714 }
  0xdc   :  { %2976 = vst [vmem:[#allocation9_spill] sm:$0xff] %v2336_v62 }
  0xdd   :  { %1905 = vset.pattern.permute.xlu1 %v2963_v3 }
  0xde   :  { %314 = vperm.xlu1 %1905, %v2085_v22  }
  0xdf   :  { %v2340_v2 = vpop.permute.xlu0 %718 }
  0xe0   :  { %2977 = vst [vmem:[#allocation10_spill] sm:$0xff] %v2340_v2  ;;  %v2342_v7 = vpop.permute.xlu1 %274  ;;  %v2981_v2 = vmov 2  }
  0xe2   :  { %1906 = vset.pattern.permute.xlu1 %v2959_v0 }
  0xe3   :  { %142 = vperm.xlu1 %1906, %v2092_v23   ;;  %v2346_v20 = vpop.permute.xlu0 %722 }
  0xe4   :  { %2978 = vst [vmem:[#allocation11_spill] sm:$0xff] %v2346_v20  ;;  %v2983_v20 = vmov 0  }
  0xe5   :  { %v2348_v9 = vpop.permute.xlu1 %92 }
  0xe7   :  { %1907 = vset.pattern.permute.xlu1 %v2963_v3  ;;  %v2351_v5 = vpop.permute.xlu0 %726 }
  0xe8   :  { %2979 = vst [vmem:[#allocation12_spill] sm:$0xff] %v2351_v5  ;;  %318 = vperm.xlu1 %1907, %v2092_v23   ;;  %v2985_v23 = vmov 1  }
  0xea   :  { %v2354_v4 = vpop.permute.xlu1 %278 }
  0xeb   :  { %v2356_v62 = vpop.permute.xlu0 %730 }
  0xec   :  { %2980 = vst [vmem:[#allocation13_spill] sm:$0xff] %v2356_v62  ;;  %1908 = vset.pattern.permute.xlu1 %v2981_v2 }
  0xed   :  { %510 = vperm.xlu1 %1908, %v2085_v22   ;;  %v375_v22 = vmul.f32 %v2186_v46, %v2225_v10  ;;  %v767_v10 = vmul.f32 %v2195_v53, %v2223_v8  ;;  %v210_v8 = vmul.f32 %v2175_v41, %v2172_v38  ;;  %v212_v38 = vmul.f32 %v2175_v41, %v2234_v11 }
  0xef   :  { %v471_v0 = vpop.permute.xlu1 %470  ;;  %v2360_v56 = vpop.permute.xlu0 %734 }
  0xf0   :  { %2982 = vst [vmem:[#allocation14_spill] sm:$0xff] %v2360_v56  ;;  %v211_v56 = vmul.f32 %v2175_v41, %v2217_v6 }
  0xf1   :  { %1909 = vset.pattern.permute.xlu1 %v2983_v20 }
  0xf2   :  { %147 = vperm.xlu1 %1909, %v2099_v24   ;;  %v407_v35 = vadd.f32 %v375_v22, %v211_v56  ;;  %v374_v56 = vmul.f32 %v2186_v46, %v2189_v49 }
  0xf3   :  { %v2364_v3 = vpop.permute.xlu0 %738 }
  0xf4   :  { %2984 = vst [vmem:[#allocation15_spill] sm:$0xff] %v2364_v3  ;;  %v2366_v5 = vpop.permute.xlu1 %97  ;;  %v603_v54 = vadd.f32 %v571_v61, %v407_v35  ;;  %v376_v35 = vmul.f32 %v2186_v46, %v2241_v13  ;;  %v406_v57 = vadd.f32 %v374_v56, %v210_v8 }
  0xf6   :  { %1910 = vset.pattern.permute.xlu1 %v2985_v23  ;;  %v799_v61 = vadd.f32 %v767_v10, %v603_v54  ;;  %v768_v54 = vmul.f32 %v2195_v53, %v2230_v12  ;;  %v378_v10 = vmul.f32 %v2186_v46, %v2281_v44 }
  0xf7   :  { %322 = vperm.xlu1 %1910, %v2099_v24   ;;  %v2370_v62 = vpop.permute.xlu0 %742 }
  0xf8   :  { %2986 = vst [vmem:[#allocation16_spill] sm:$0xff] %v2370_v62  ;;  %v377_v62 = vmul.f32 %v2186_v46, %v2265_v16  ;;  %v835_v11 = vadd.f32 %v2215_v1, %v799_v61 }
  0xf9   :  { %v283_v59 = vpop.permute.xlu1 %282 }
  0xfa   :  { %v409_v16 = vadd.f32 %v377_v62, %v213_v34  ;;  %v867_v61 = vmax.f32 %v835_v11, 0.0 }
  0xfb   :  { %1911 = vset.pattern.permute.xlu1 %v2983_v20  ;;  %v2379_v3 = vpop.permute.xlu0 %746 }
  0xfc   :  { %2987 = vst [vmem:[#allocation17_spill] sm:$0xff] %v2379_v3  ;;  %152 = vperm.xlu1 %1911, %v2106_v25   ;;  %v573_v3 = vmul.f32 %v2193_v52, %v2288_v47 }
  0xfe   :  { %v2384_v33 = vpop.permute.xlu1 %102  ;;  %v605_v47 = vadd.f32 %v573_v3, %v409_v16  ;;  %v215_v3 = vmul.f32 %v2175_v41, %v2295_v19  ;;  %v381_v19 = vmul.f32 %v2186_v46, %v2342_v7  ;;  %v577_v7 = vmul.f32 %v2193_v52, %v471_v0 }
  0xff   :  { %v2388_v6 = vpop.permute.xlu0 %750  ;;  %v380_v0 = vmul.f32 %v2186_v46, %v2321_v58  ;;  %v775_v58 = vmul.f32 %v2195_v53, %v2274_v42  ;;  %v218_v42 = vmul.f32 %v2175_v41, %v2348_v9 }
 0x100   :  { %2988 = vst [vmem:[#allocation18_spill] sm:$0xff] %v2388_v6  ;;  %1912 = vset.pattern.permute.xlu1 %v2985_v23  ;;  %v379_v6 = vmul.f32 %v2186_v46, %v2301_v18  ;;  %v408_v18 = vadd.f32 %v376_v35, %v212_v38  ;;  %v801_v34 = vadd.f32 %v769_v36, %v605_v47 }
 0x101   :  { %326 = vperm.xlu1 %1912, %v2106_v25   ;;  %v766_v25 = vmul.f32 %v2195_v53, %v2210_v63  ;;  %v770_v63 = vmul.f32 %v2195_v53, %v2243_v32 }
 0x102   :  { %v411_v12 = vadd.f32 %v379_v6, %v215_v3  ;;  %v217_v6 = vmul.f32 %v2175_v41, %v2334_v21 }
 0x103   :  { %v2402_v22 = vpop.permute.xlu1 %286 }
 0x104   :  { %v443_v49 = vpop.permute.xlu0 %442  ;;  %v607_v44 = vadd.f32 %v575_v14, %v411_v12  ;;  %v413_v47 = vadd.f32 %v381_v19, %v217_v6  ;;  %v774_v6 = vmul.f32 %v2195_v53, %v2267_v39  ;;  %v384_v9 = vmul.f32 %v2186_v46, %v2402_v22 }
 0x105   :  { %v570_v13 = vmul.f32 %v2193_v52, %v443_v49  ;;  %1913 = vset.pattern.permute.xlu1 %v2981_v2  ;;  %v383_v49 = vmul.f32 %v2186_v46, %v283_v59  ;;  %v216_v59 = vmul.f32 %v2175_v41, %v2309_v55  ;;  %v220_v39 = vmul.f32 %v2175_v41, %v2384_v33 }
 0x106   :  { %518 = vperm.xlu1 %1913, %v2099_v24   ;;  %v771_v24 = vmul.f32 %v2195_v53, %v2248_v15  ;;  %v773_v15 = vmul.f32 %v2195_v53, %v2261_v37  ;;  %v609_v14 = vadd.f32 %v577_v7, %v413_v47  ;;  %v776_v22 = vmul.f32 %v2195_v53, %v2279_v43 }
 0x107   :  { %v602_v62 = vadd.f32 %v570_v13, %v406_v57  ;;  %v214_v57 = vmul.f32 %v2175_v41, %v2272_v40  ;;  %v837_v40 = vadd.f32 %v2215_v1, %v801_v34  ;;  %v412_v12 = vadd.f32 %v380_v0, %v216_v59 }
 0x108   :  { %v479_v56 = vpop.permute.xlu1 %478  ;;  %v451_v16 = vpop.permute.xlu0 %450  ;;  %v803_v3 = vadd.f32 %v771_v24, %v607_v44  ;;  %v416_v0 = vadd.f32 %v384_v9, %v220_v39 }
 0x109   :  { %v798_v32 = vadd.f32 %v766_v25, %v602_v62  ;;  %v572_v8 = vmul.f32 %v2193_v52, %v451_v16  ;;  %v410_v36 = vadd.f32 %v378_v10, %v214_v57  ;;  %v579_v11 = vmul.f32 %v2193_v52, %v479_v56 }
 0x10a   :  { %1914 = vset.pattern.permute.xlu1 %v2983_v20  ;;  %v869_v55 = vmax.f32 %v837_v40, 0.0  ;;  %v839_v24 = vadd.f32 %v2215_v1, %v803_v3 }
 0x10b   :  { %v834_v35 = vadd.f32 %v2215_v1, %v798_v32  ;;  %v604_v17 = vadd.f32 %v572_v8, %v408_v18  ;;  %157 = vperm.xlu1 %1914, %v2113_v26   ;;  %v219_v18 = vmul.f32 %v2175_v41, %v2366_v5  ;;  %v805_v32 = vadd.f32 %v773_v15, %v609_v14 }
 0x10c   :  { %v459_v21 = vpop.permute.xlu0 %458  ;;  %v871_v40 = vmax.f32 %v839_v24, 0.0 }
 0x10d   :  { %v866_v25 = vmax.f32 %v834_v35, 0.0  ;;  %v800_v38 = vadd.f32 %v768_v54, %v604_v17  ;;  %v574_v37 = vmul.f32 %v2193_v52, %v459_v21  ;;  %v2448_v13 = vpop.permute.xlu1 %107  ;;  %v382_v54 = vmul.f32 %v2186_v46, %v2354_v4 }
 0x10e   :  { %v415_v34 = vadd.f32 %v383_v49, %v219_v18 }
 0x10f   :  { %v836_v62 = vadd.f32 %v2215_v1, %v800_v38  ;;  %v606_v10 = vadd.f32 %v574_v37, %v410_v36  ;;  %1915 = vset.pattern.permute.xlu1 %v2985_v23  ;;  %1671 = vmatmul.mubr.msk.f32.vlgmr.msra.gmra.mrb[0].mxu0 %vm906_vm0, %v866_v25  ;;  %v414_v7 = vadd.f32 %v382_v54, %v218_v42 }
 0x110   :  { %330 = vperm.xlu1 %1915, %v2113_v26   ;;  %1673 = vmatprep.mubr.msk.f32.mxu0 %vm906_vm0, %v867_v61  ;;  %v467_v5 = vpop.permute.xlu0 %466  ;;  %v611_v8 = vadd.f32 %v579_v11, %v415_v34  ;;  %v841_v61 = vadd.f32 %v2215_v1, %v805_v32  ;;  %v777_v42 = vmul.f32 %v2195_v53, %v2286_v45 }
 0x111   :  { %v868_v19 = vmax.f32 %v836_v62, 0.0  ;;  %v802_v56 = vadd.f32 %v770_v63, %v606_v10  ;;  %v576_v16 = vmul.f32 %v2193_v52, %v467_v5  ;;  %v778_v5 = vmul.f32 %v2195_v53, %v2292_v48 }
 0x112   :  { %v291_v4 = vpop.permute.xlu1 %290  ;;  %v807_v36 = vadd.f32 %v775_v58, %v611_v8  ;;  %v873_v3 = vmax.f32 %v841_v61, 0.0 }
 0x113   :  { %v838_v57 = vadd.f32 %v2215_v1, %v802_v56  ;;  %v608_v44 = vadd.f32 %v576_v16, %v412_v12  ;;  %1674 = vmatmul.mubr.msk.f32.gmra.mrb[2].mxu0 %vm906_vm0, %v868_v19  ;;  %v221_v19 = vmul.f32 %v2175_v41, %v2448_v13 }
 0x114   :  { %1916 = vset.pattern.permute.xlu1 %v2983_v20  ;;  %1676 = vmatprep.mubr.msk.f32.mxu0 %vm906_vm0, %v869_v55  ;;  %v475_v63 = vpop.permute.xlu0 %474  ;;  %v843_v33 = vadd.f32 %v2215_v1, %v807_v36 }
 0x115   :  { %v870_v15 = vmax.f32 %v838_v57, 0.0  ;;  %v804_v35 = vadd.f32 %v772_v60, %v608_v44  ;;  %v578_v17 = vmul.f32 %v2193_v52, %v475_v63  ;;  %162 = vperm.xlu1 %1916, %v2120_v27  }
 0x116   :  { %v875_v34 = vmax.f32 %v843_v33, 0.0 }
 0x117   :  { %v840_v47 = vadd.f32 %v2215_v1, %v804_v35  ;;  %v610_v49 = vadd.f32 %v578_v17, %v414_v7  ;;  %v113_v21 = vpop.permute.xlu1 %112  ;;  %1677 = vmatmul.mubr.msk.f32.gmra.mrb[4].mxu0 %vm906_vm0, %v870_v15 }
 0x118   :  { %1679 = vmatprep.mubr.msk.f32.mxu0 %vm906_vm0, %v871_v40  ;;  %v483_v60 = vpop.permute.xlu0 %482  ;;  %v222_v43 = vmul.f32 %v2175_v41, %v113_v21  ;;  %v780_v40 = vmul.f32 %v2195_v53, %v2303_v51  ;;  %v779_v21 = vmul.f32 %v2195_v53, %v2297_v50 }
 0x119   :  { %v872_v25 = vmax.f32 %v840_v47, 0.0  ;;  %v806_v38 = vadd.f32 %v774_v6, %v610_v49  ;;  %v580_v37 = vmul.f32 %v2193_v52, %v483_v60  ;;  %1917 = vset.pattern.permute.xlu1 %v2985_v23 }
 0x11a   :  { %334 = vperm.xlu1 %1917, %v2120_v27   ;;  %v385_v27 = vmul.f32 %v2186_v46, %v291_v4 }
 0x11b   :  { %v842_v14 = vadd.f32 %v2215_v1, %v806_v38  ;;  %v612_v18 = vadd.f32 %v580_v37, %v416_v0  ;;  %1680 = vmatmul.mubr.msk.f32.gmra.mrb[6].mxu0 %vm906_vm0, %v872_v25 }
 0x11c   :  { %v295_v11 = vpop.permute.xlu1 %294  ;;  %1682 = vmatprep.mubr.msk.f32.mxu0 %vm906_vm0, %v873_v3  ;;  %v491_v59 = vpop.permute.xlu0 %490  ;;  %v417_v32 = vadd.f32 %v385_v27, %v221_v19 }
 0x11d   :  { %v874_v62 = vmax.f32 %v842_v14, 0.0  ;;  %v808_v10 = vadd.f32 %v776_v22, %v612_v18  ;;  %v386_v58 = vmul.f32 %v2186_v46, %v295_v11  ;;  %v582_v54 = vmul.f32 %v2193_v52, %v491_v59 }
 0x11e   :  { %1918 = vset.pattern.permute.xlu1 %v2981_v2 }
 0x11f   :  { %v844_v55 = vadd.f32 %v2215_v1, %v808_v10  ;;  %v418_v12 = vadd.f32 %v386_v58, %v222_v43  ;;  %526 = vperm.xlu1 %1918, %v2113_v26   ;;  %1683 = vmatmul.mubr.msk.f32.gmra.mrb[8].mxu0 %vm906_vm0, %v874_v62  ;;  %v2989_v58 = vld [vmem:[#allocation6_spill] sm:$0xff] }
 0x120   :  { %1685 = vmatprep.mubr.msk.f32.mxu0 %vm906_vm0, %v875_v34  ;;  %v499_v9 = vpop.permute.xlu0 %498  ;;  %v1260_v34 = vld [vmem:[%s2954_s1 + $0x38] sm:$0xff] }
 0x121   :  { %v876_v56 = vmax.f32 %v844_v55, 0.0  ;;  %v614_v16 = vadd.f32 %v582_v54, %v418_v12  ;;  %v487_v24 = vpop.permute.xlu1 %486  ;;  %v584_v61 = vmul.f32 %v2193_v52, %v499_v9  ;;  %v782_v54 = vmul.f32 %v2195_v53, %v2989_v58 }
 0x122   :  { %v581_v48 = vmul.f32 %v2193_v52, %v487_v24 }
 0x123   :  { %v810_v8 = vadd.f32 %v778_v5, %v614_v16  ;;  %1919 = vset.pattern.permute.xlu1 %v2983_v20  ;;  %1686 = vmatmul.mubr.msk.f32.gmra.mrb[10].mxu0 %vm906_vm0, %v876_v56  ;;  %v1261_v5 = vld [vmem:[%s2954_s1 + $0x40] sm:$0xff]  ;;  %v2990_v56 = vld [vmem:[#allocation4_spill] sm:$0xff] }
 0x124   :  { %v613_v26 = vadd.f32 %v581_v48, %v417_v32  ;;  %167 = vperm.xlu1 %1919, %v2127_v28   ;;  %v507_v18 = vpop.permute.xlu0 %506  ;;  %v1806_v19 = vpack.c.bf16 %v1261_v5, %v1260_v34  ;;  %v781_v16 = vmul.f32 %v2195_v53, %v2990_v56  ;;  %v2991_v48 = vld [vmem:[#allocation2_spill] sm:$0xff]  ;;  %v1275_v34 = vld [vmem:[%s2954_s1 + $0xb0] sm:$0xff]  ;;  %v2994_v5 = vld [vmem:[#allocation7_spill] sm:$0xff] }
 0x125   :  { %v846_v57 = vadd.f32 %v2215_v1, %v810_v8  ;;  %v586_v62 = vmul.f32 %v2193_v52, %v507_v18  ;;  %v1262_v8 = vld [vmem:[%s2954_s1 + $0x48] sm:$0xff] }
 0x126   :  { %v809_v13 = vadd.f32 %v777_v42, %v613_v26  ;;  %v118_v4 = vpop.permute.xlu1 %117  ;;  %1838 = vmatprep.subr.bf16.mxu1 %v1806_v19  ;;  %v1263_v26 = vld [vmem:[%s2954_s1 + $0x50] sm:$0xff]  ;;  %1807 = vmatprep.subr.bf16.mxu0 %v1806_v19 }
 0x127   :  { %v878_v6 = vmax.f32 %v846_v57, 0.0  ;;  %1846 = vmatpush3.bf16.msra.mxu1 %v1806_v19  ;;  %1809 = vmatpush3.bf16.msra.mxu0 %v1806_v19 }
 0x128   :  { %v845_v44 = vadd.f32 %v2215_v1, %v809_v13  ;;  %1920 = vset.pattern.permute.xlu1 %v2985_v23  ;;  %v1810_v13 = vpack.c.bf16 %v1263_v26, %v1262_v8  ;;  %v2995_v8 = vld [vmem:[#allocation5_spill] sm:$0xff] }
 0x129   :  { %338 = vperm.xlu1 %1920, %v2127_v28  }
 0x12a   :  { %v877_v45 = vmax.f32 %v845_v44, 0.0  ;;  %1839 = vmatprep.subr.bf16.mxu1 %v1810_v13  ;;  %1811 = vmatprep.subr.bf16.mxu0 %v1810_v13 }
 0x12b   :  { %v299_v7 = vpop.permute.xlu1 %298  ;;  %1847 = vmatpush3.bf16.msra.mxu1 %v1810_v13  ;;  %1813 = vmatpush3.bf16.msra.mxu0 %v1810_v13 }
 0x12c   :  { %1688 = vmatprep.mubr.msk.f32.mxu0 %vm906_vm0, %v877_v45  ;;  %v387_v36 = vmul.f32 %v2186_v46, %v299_v7  ;;  %v1265_v7 = vld [vmem:[%s2954_s1 + $0x60] sm:$0xff] }
 0x12d   :  { %1921 = vset.pattern.permute.xlu1 %v2983_v20  ;;  %1689 = vmatmul.mubr.msk.f32.gmra.mrb[12].mxu0 %vm906_vm0, %v878_v6  ;;  %v1264_v6 = vld [vmem:[%s2954_s1 + $0x58] sm:$0xff] }
 0x12e   :  { %172 = vperm.xlu1 %1921, %v2135_v29  }
 0x130   :  { %v123_v63 = vpop.permute.xlu1 %122 }
 0x131   :  { %v224_v35 = vmul.f32 %v2175_v41, %v123_v63  ;;  %v1814_v63 = vpack.c.bf16 %v1265_v7, %v1264_v6 }
 0x132   :  { %1922 = vset.pattern.permute.xlu1 %v2985_v23 }
 0x133   :  { %342 = vperm.xlu1 %1922, %v2135_v29   ;;  %v223_v29 = vmul.f32 %v2175_v41, %v118_v4  ;;  %1840 = vmatprep.subr.bf16.mxu1 %v1814_v63 }
 0x134   :  { %1815 = vmatprep.subr.bf16.mxu0 %v1814_v63  ;;  %1848 = vmatpush3.bf16.msra.mxu1 %v1814_v63 }
 0x135   :  { %v303_v15 = vpop.permute.xlu1 %302  ;;  %v419_v22 = vadd.f32 %v387_v36, %v223_v29  ;;  %1817 = vmatpush3.bf16.msra.mxu0 %v1814_v63  ;;  %v1268_v29 = vld [vmem:[%s2954_s1 + $0x78] sm:$0xff]  ;;  %v2996_v63 = vld [vmem:[#allocation10_spill] sm:$0xff] }
 0x136   :  { %v388_v17 = vmul.f32 %v2186_v46, %v303_v15 }
 0x137   :  { %1923 = vset.pattern.permute.xlu1 %v2981_v2 }
 0x138   :  { %v420_v39 = vadd.f32 %v388_v17, %v224_v35  ;;  %534 = vperm.xlu1 %1923, %v2127_v28   ;;  %v1266_v17 = vld [vmem:[%s2954_s1 + $0x68] sm:$0xff] }
 0x13a   :  { %v616_v47 = vadd.f32 %v584_v61, %v420_v39  ;;  %v495_v49 = vpop.permute.xlu1 %494  ;;  %v1267_v61 = vld [vmem:[%s2954_s1 + $0x70] sm:$0xff] }
 0x13b   :  { %v583_v60 = vmul.f32 %v2193_v52, %v495_v49  ;;  %v1818_v36 = vpack.c.bf16 %v1267_v61, %v1266_v17 }
 0x13c   :  { %v812_v0 = vadd.f32 %v780_v40, %v616_v47  ;;  %1924 = vset.pattern.permute.xlu1 %v2983_v20  ;;  %v2992_v40 = vld [vmem:[#allocation3_spill] sm:$0xff]  ;;  %v1269_v47 = vld [vmem:[%s2954_s1 + $0x80] sm:$0xff] }
 0x13d   :  { %v615_v25 = vadd.f32 %v583_v60, %v419_v22  ;;  %177 = vperm.xlu1 %1924, %v2142_v30   ;;  %1841 = vmatprep.subr.bf16.mxu1 %v1818_v36  ;;  %v1822_v49 = vpack.c.bf16 %v1269_v47, %v1268_v29  ;;  %v1270_v22 = vld [vmem:[%s2954_s1 + $0x88] sm:$0xff]  ;;  %v1271_v60 = vld [vmem:[%s2954_s1 + $0x90] sm:$0xff] }
 0x13e   :  { %v848_v28 = vadd.f32 %v2215_v1, %v812_v0  ;;  %1819 = vmatprep.subr.bf16.mxu0 %v1818_v36  ;;  %1849 = vmatpush3.bf16.msra.mxu1 %v1818_v36 }
 0x13f   :  { %v811_v51 = vadd.f32 %v779_v21, %v615_v25  ;;  %v128_v38 = vpop.permute.xlu1 %127  ;;  %1821 = vmatpush3.bf16.msra.mxu0 %v1818_v36  ;;  %v515_v21 = vpop.permute.xlu0 %514  ;;  %1842 = vmatprep.subr.bf16.mxu1 %v1822_v49  ;;  %v1826_v25 = vpack.c.bf16 %v1271_v60, %v1270_v22  ;;  %v2997_v36 = vmov 3  }
 0x140   :  { %v880_v33 = vmax.f32 %v848_v28, 0.0  ;;  %1823 = vmatprep.subr.bf16.mxu0 %v1822_v49  ;;  %v588_v28 = vmul.f32 %v2193_v52, %v515_v21 }
 0x141   :  { %v847_v37 = vadd.f32 %v2215_v1, %v811_v51  ;;  %1925 = vset.pattern.permute.xlu1 %v2985_v23 }
 0x142   :  { %346 = vperm.xlu1 %1925, %v2142_v30   ;;  %1850 = vmatpush3.bf16.msra.mxu1 %v1822_v49 }
 0x143   :  { %v879_v50 = vmax.f32 %v847_v37, 0.0  ;;  %1825 = vmatpush3.bf16.msra.mxu0 %v1822_v49  ;;  %1843 = vmatprep.subr.bf16.mxu1 %v1826_v25  ;;  %v523_v13 = vpop.permute.xlu0 %522 }
 0x144   :  { %v307_v3 = vpop.permute.xlu1 %306  ;;  %1827 = vmatprep.subr.bf16.mxu0 %v1826_v25 }
 0x145   :  { %1691 = vmatprep.mubr.msk.f32.mxu0 %vm906_vm0, %v879_v50  ;;  %v389_v10 = vmul.f32 %v2186_v46, %v307_v3  ;;  %v1273_v3 = vld [vmem:[%s2954_s1 + $0xa0] sm:$0xff] }
 0x146   :  { %1926 = vset.pattern.permute.xlu1 %v2983_v20  ;;  %1692 = vmatmul.mubr.msk.f32.gmra.mrb[14].mxu0 %vm906_vm0, %v880_v33  ;;  %v1272_v33 = vld [vmem:[%s2954_s1 + $0x98] sm:$0xff] }
 0x147   :  { %182 = vperm.xlu1 %1926, %v2150_v31   ;;  %1851 = vmatpush3.bf16.msra.mxu1 %v1826_v25  ;;  %v1830_v18 = vpack.c.bf16 %v1273_v3, %v1272_v33 }
 0x148   :  { %1829 = vmatpush3.bf16.msra.mxu0 %v1826_v25 }
 0x149   :  { %v133_v14 = vpop.permute.xlu1 %132  ;;  %1844 = vmatprep.subr.bf16.mxu1 %v1830_v18  ;;  %1831 = vmatprep.subr.bf16.mxu0 %v1830_v18 }
 0x14a   :  { %v226_v11 = vmul.f32 %v2175_v41, %v133_v14 }
 0x14b   :  { %1927 = vset.pattern.permute.xlu1 %v2985_v23  ;;  %1852 = vmatpush3.bf16.msra.mxu1 %v1830_v18 }
 0x14c   :  { %350 = vperm.xlu1 %1927, %v2150_v31   ;;  %v225_v31 = vmul.f32 %v2175_v41, %v128_v38  ;;  %1833 = vmatpush3.bf16.msra.mxu0 %v1830_v18  ;;  %v2999_v18 = vld [vmem:[#allocation12_spill] sm:$0xff] }
 0x14e   :  { %v311_v43 = vpop.permute.xlu1 %310  ;;  %v421_v24 = vadd.f32 %v389_v10, %v225_v31  ;;  %v41_v10 = vld [vmem:[%s2953_s0 + $0xf0] sm:$0xff]  ;;  %v1274_v31 = vld [vmem:[%s2954_s1 + $0xa8] sm:$0xff] }
 0x14f   :  { %v390_v59 = vmul.f32 %v2186_v46, %v311_v43  ;;  %v2993_v43 = vld [vmem:[#allocation8_spill] sm:$0xff]  ;;  %v1834_v19 = vpack.c.bf16 %v1275_v34, %v1274_v31 }
 0x150   :  { %1928 = vset.pattern.permute.xlu1 %v2981_v2 }
 0x151   :  { %v422_v27 = vadd.f32 %v390_v59, %v226_v11  ;;  %542 = vperm.xlu1 %1928, %v2142_v30   ;;  %v784_v11 = vmul.f32 %v2195_v53, %v2993_v43  ;;  %1845 = vmatprep.subr.bf16.mxu1 %v1834_v19  ;;  %v788_v43 = vmul.f32 %v2195_v53, %v2999_v18  ;;  %v3004_v18 = vld [vmem:[#allocation15_spill] sm:$0xff] }
 0x152   :  { %1835 = vmatprep.subr.bf16.mxu0 %v1834_v19  ;;  %1853 = vmatpush3.bf16.msra.mxu1 %v1834_v19 }
 0x153   :  { %v618_v55 = vadd.f32 %v586_v62, %v422_v27  ;;  %v503_v12 = vpop.permute.xlu1 %502  ;;  %1837 = vmatpush3.bf16.msra.mxu0 %v1834_v19 }
 0x154   :  { %v585_v42 = vmul.f32 %v2193_v52, %v503_v12 }
 0x155   :  { %v814_v30 = vadd.f32 %v782_v54, %v618_v55  ;;  %1929 = vset.pattern.permute.xlu1 %v2983_v20  ;;  %v783_v55 = vmul.f32 %v2195_v53, %v2994_v5 }
 0x156   :  { %v617_v32 = vadd.f32 %v585_v42, %v421_v24  ;;  %187 = vperm.xlu1 %1929, %v2991_v48  }
 0x157   :  { %v850_v44 = vadd.f32 %v2215_v1, %v814_v30 }
 0x158   :  { %v813_v4 = vadd.f32 %v781_v16, %v617_v32  ;;  %v138_v57 = vpop.permute.xlu1 %137 }
 0x159   :  { %v882_v15 = vmax.f32 %v850_v44, 0.0  ;;  %v227_v14 = vmul.f32 %v2175_v41, %v138_v57 }
 0x15a   :  { %v849_v45 = vadd.f32 %v2215_v1, %v813_v4  ;;  %1930 = vset.pattern.permute.xlu1 %v2985_v23 }
 0x15b   :  { %354 = vperm.xlu1 %1930, %v2991_v48  }
 0x15c   :  { %v881_v9 = vmax.f32 %v849_v45, 0.0  ;;  %v590_v45 = vmul.f32 %v2193_v52, %v523_v13 }
 0x15d   :  { %v315_v35 = vpop.permute.xlu1 %314 }
 0x15e   :  { %1694 = vmatprep.mubr.msk.f32.mxu0 %vm906_vm0, %v881_v9  ;;  %v391_v37 = vmul.f32 %v2186_v46, %v315_v35 }
 0x15f   :  { %1931 = vset.pattern.permute.xlu1 %v2983_v20  ;;  %1695 = vmatmul.mubr.msk.f32.gmra.mrb[16].mxu0 %vm906_vm0, %v882_v15 }
 0x160   :  { %192 = vperm.xlu1 %1931, %v2992_v40   ;;  %v423_v58 = vadd.f32 %v391_v37, %v227_v14 }
 0x162   :  { %v143_v39 = vpop.permute.xlu1 %142 }
 0x163   :  { %v228_v51 = vmul.f32 %v2175_v41, %v143_v39 }
 0x164   :  { %1932 = vset.pattern.permute.xlu1 %v2985_v23 }
 0x165   :  { %358 = vperm.xlu1 %1932, %v2992_v40   ;;  %v2998_v40 = vld [vmem:[#allocation9_spill] sm:$0xff] }
 0x166   :  { %v785_v39 = vmul.f32 %v2195_v53, %v2998_v40 }
 0x167   :  { %v319_v0 = vpop.permute.xlu1 %318 }
 0x168   :  { %v392_v38 = vmul.f32 %v2186_v46, %v319_v0 }
 0x169   :  { %1933 = vset.pattern.permute.xlu1 %v2981_v2 }
 0x16a   :  { %v424_v50 = vadd.f32 %v392_v38, %v228_v51  ;;  %550 = vperm.xlu1 %1933, %v2991_v48   ;;  %v531_v51 = vpop.permute.xlu0 %530 }
 0x16c   :  { %v620_v59 = vadd.f32 %v588_v28, %v424_v50  ;;  %v511_v62 = vpop.permute.xlu1 %510  ;;  %v592_v50 = vmul.f32 %v2193_v52, %v531_v51 }
 0x16d   :  { %v587_v54 = vmul.f32 %v2193_v52, %v511_v62 }
 0x16e   :  { %v816_v27 = vadd.f32 %v784_v11, %v620_v59  ;;  %1934 = vset.pattern.permute.xlu1 %v2983_v20 }
 0x16f   :  { %v619_v12 = vadd.f32 %v587_v54, %v423_v58  ;;  %197 = vperm.xlu1 %1934, %v41_v10   ;;  %v3000_v54 = vld [vmem:[#allocation11_spill] sm:$0xff] }
 0x170   :  { %v852_v24 = vadd.f32 %v2215_v1, %v816_v27  ;;  %v787_v27 = vmul.f32 %v2195_v53, %v3000_v54 }
 0x171   :  { %v815_v56 = vadd.f32 %v783_v55, %v619_v12  ;;  %v148_v16 = vpop.permute.xlu1 %147 }
 0x172   :  { %v884_v32 = vmax.f32 %v852_v24, 0.0  ;;  %v229_v7 = vmul.f32 %v2175_v41, %v148_v16 }
 0x173   :  { %v851_v42 = vadd.f32 %v2215_v1, %v815_v56  ;;  %1935 = vset.pattern.permute.xlu1 %v2985_v23 }
 0x174   :  { %362 = vperm.xlu1 %1935, %v41_v10  }
 0x175   :  { %v883_v30 = vmax.f32 %v851_v42, 0.0  ;;  %v539_v42 = vpop.permute.xlu0 %538 }
 0x176   :  { %v323_v48 = vpop.permute.xlu1 %322 }
 0x177   :  { %1697 = vmatprep.mubr.msk.f32.mxu0 %vm906_vm0, %v883_v30  ;;  %v393_v6 = vmul.f32 %v2186_v46, %v323_v48 }
 0x178   :  { %1936 = vset.pattern.permute.xlu1 %v2983_v20  ;;  %1698 = vmatmul.mubr.msk.f32.gmra.mrb[18].mxu0 %vm906_vm0, %v884_v32 }
 0x179   :  { %202 = vperm.xlu1 %1936, %v2995_v8   ;;  %v425_v35 = vadd.f32 %v393_v6, %v229_v7 }
 0x17b   :  { %v153_v26 = vpop.permute.xlu1 %152 }
 0x17c   :  { %v230_v57 = vmul.f32 %v2175_v41, %v153_v26 }
 0x17d   :  { %1937 = vset.pattern.permute.xlu1 %v2985_v23  ;;  %v786_v23 = vmul.f32 %v2195_v53, %v2996_v63  ;;  %v3002_v63 = vld [vmem:[#allocation13_spill] sm:$0xff] }
 0x17e   :  { %366 = vperm.xlu1 %1937, %v2995_v8  }
 0x180   :  { %v327_v4 = vpop.permute.xlu1 %326 }
 0x181   :  { %v394_v44 = vmul.f32 %v2186_v46, %v327_v4  ;;  %v3001_v4 = vld [vmem:[#allocation14_spill] sm:$0xff] }
 0x182   :  { %1939 = vset.pattern.permute.xlu1 %v2981_v2 }
 0x183   :  { %v426_v20 = vadd.f32 %v394_v44, %v230_v57  ;;  %558 = vperm.xlu1 %1939, %v41_v10   ;;  %v790_v57 = vmul.f32 %v2195_v53, %v3001_v4 }
 0x185   :  { %v622_v9 = vadd.f32 %v590_v45, %v426_v20  ;;  %v519_v15 = vpop.permute.xlu1 %518 }
 0x186   :  { %v589_v17 = vmul.f32 %v2193_v52, %v519_v15 }
 0x187   :  { %v818_v61 = vadd.f32 %v786_v23, %v622_v9  ;;  %1940 = vset.pattern.permute.xlu1 %v2997_v36  ;;  %v789_v23 = vmul.f32 %v2195_v53, %v3002_v63 }
 0x188   :  { %v621_v29 = vadd.f32 %v589_v17, %v425_v35  ;;  %754 = vperm.xlu1 %1940, %v41_v10   ;;  %v2687_v17 = vld [vmem:[%s2954_s1 + $0x8] ss:$0 sm:$0xff] }
 0x189   :  { %v854_v49 = vadd.f32 %v2215_v1, %v818_v61 }
 0x18a   :  { %v817_v2 = vadd.f32 %v785_v39, %v621_v29  ;;  %v158_v47 = vpop.permute.xlu1 %157 }
 0x18b   :  { %v886_v60 = vmax.f32 %v854_v49, 0.0  ;;  %v231_v14 = vmul.f32 %v2175_v41, %v158_v47  ;;  %v547_v47 = vpop.permute.xlu0 %546 }
 0x18c   :  { %v853_v21 = vadd.f32 %v2215_v1, %v817_v2  ;;  %758 = vperm.xlu1 %1940, %v2995_v8   ;;  %v594_v8 = vmul.f32 %v2193_v52, %v539_v42 }
 0x18e   :  { %v885_v22 = vmax.f32 %v853_v21, 0.0  ;;  %v596_v21 = vmul.f32 %v2193_v52, %v547_v47 }
 0x18f   :  { %v331_v0 = vpop.permute.xlu1 %330 }
 0x190   :  { %1700 = vmatprep.mubr.msk.f32.mxu0 %vm906_vm0, %v885_v22  ;;  %v395_v33 = vmul.f32 %v2186_v46, %v331_v0 }
 0x191   :  { %1701 = vmatmul.mubr.msk.f32.gmra.mrb[20].mxu0 %vm906_vm0, %v886_v60 }
 0x192   :  { %v427_v62 = vadd.f32 %v395_v33, %v231_v14 }
 0x194   :  { %v163_v25 = vpop.permute.xlu1 %162 }
 0x195   :  { %v232_v28 = vmul.f32 %v2175_v41, %v163_v25 }
 0x199   :  { %v335_v38 = vpop.permute.xlu1 %334 }
 0x19a   :  { %v396_v37 = vmul.f32 %v2186_v46, %v335_v38  ;;  %v3003_v38 = vld [vmem:[#allocation16_spill] sm:$0xff] }
 0x19c   :  { %v428_v3 = vadd.f32 %v396_v37, %v232_v28  ;;  %v792_v28 = vmul.f32 %v2195_v53, %v3003_v38 }
 0x19e   :  { %v624_v11 = vadd.f32 %v592_v50, %v428_v3  ;;  %v527_v59 = vpop.permute.xlu1 %526 }
 0x19f   :  { %v591_v10 = vmul.f32 %v2193_v52, %v527_v59 }
 0x1a0   :  { %v820_v58 = vadd.f32 %v788_v43, %v624_v11  ;;  %v791_v43 = vmul.f32 %v2195_v53, %v3004_v18 }
 0x1a1   :  { %v623_v31 = vadd.f32 %v591_v10, %v427_v62 }
 0x1a2   :  { %v856_v55 = vadd.f32 %v2215_v1, %v820_v58 }
 0x1a3   :  { %v819_v34 = vadd.f32 %v787_v27, %v623_v31  ;;  %v168_v5 = vpop.permute.xlu1 %167 }
 0x1a4   :  { %v888_v56 = vmax.f32 %v856_v55, 0.0 }
 0x1a5   :  { %v855_v12 = vadd.f32 %v2215_v1, %v819_v34  ;;  %v233_v1 = vmul.f32 %v2175_v41, %v168_v5 }
 0x1a7   :  { %v887_v19 = vmax.f32 %v855_v12, 0.0 }
 0x1a8   :  { %v339_v16 = vpop.permute.xlu1 %338 }
 0x1a9   :  { %1703 = vmatprep.mubr.msk.f32.mxu0 %vm906_vm0, %v887_v19  ;;  %v397_v26 = vmul.f32 %v2186_v46, %v339_v16  ;;  %v555_v16 = vpop.permute.xlu0 %554 }
 0x1aa   :  { %1704 = vmatmul.mubr.msk.f32.gmra.mrb[22].mxu0 %vm906_vm0, %v888_v56 }
 0x1ab   :  { %v429_v6 = vadd.f32 %v397_v26, %v233_v1  ;;  %v3005_v26 = vld [vmem:[#allocation18_spill] sm:$0xff] }
 0x1ad   :  { %v173_v24 = vpop.permute.xlu1 %172 }
 0x1ae   :  { %v234_v32 = vmul.f32 %v2175_v41, %v173_v24 }
 0x1b2   :  { %v343_v30 = vpop.permute.xlu1 %342 }
 0x1b3   :  { %v398_v48 = vmul.f32 %v2186_v46, %v343_v30  ;;  %v598_v30 = vmul.f32 %v2193_v52, %v555_v16 }
 0x1b5   :  { %v430_v13 = vadd.f32 %v398_v48, %v234_v32 }
 0x1b7   :  { %v626_v44 = vadd.f32 %v594_v8, %v430_v13  ;;  %v535_v45 = vpop.permute.xlu1 %534  ;;  %v794_v13 = vmul.f32 %v2195_v53, %v3005_v26 }
 0x1b8   :  { %v593_v20 = vmul.f32 %v2193_v52, %v535_v45 }
 0x1b9   :  { %v822_v7 = vadd.f32 %v790_v57, %v626_v44 }
 0x1ba   :  { %v625_v9 = vadd.f32 %v593_v20, %v429_v6 }
 0x1bb   :  { %v858_v61 = vadd.f32 %v2687_v17, %v822_v7  ;;  %v3006_v7 = vld [vmem:[#allocation17_spill] sm:$0xff] }
 0x1bc   :  { %v821_v15 = vadd.f32 %v789_v23, %v625_v9  ;;  %v178_v35 = vpop.permute.xlu1 %177  ;;  %v793_v63 = vmul.f32 %v2195_v53, %v3006_v7  ;;  %v2732_v9 = vld [vmem:[%s2954_s1 + $0x30] ss:$0 sm:$0xff] }
 0x1bd   :  { %v890_v39 = vmax.f32 %v858_v61, 0.0  ;;  %v235_v51 = vmul.f32 %v2175_v41, %v178_v35 }
 0x1be   :  { %v857_v36 = vadd.f32 %v2687_v17, %v821_v15 }
 0x1c0   :  { %v889_v40 = vmax.f32 %v857_v36, 0.0 }
 0x1c1   :  { %v347_v29 = vpop.permute.xlu1 %346 }
 0x1c2   :  { %1706 = vmatprep.mubr.msk.f32.mxu0 %vm906_vm0, %v889_v40  ;;  %v399_v0 = vmul.f32 %v2186_v46, %v347_v29 }
 0x1c3   :  { %1707 = vmatmul.mubr.msk.f32.gmra.mrb[24].mxu0 %vm906_vm0, %v890_v39 }
 0x1c4   :  { %v431_v33 = vadd.f32 %v399_v0, %v235_v51 }
 0x1c6   :  { %v183_v2 = vpop.permute.xlu1 %182 }
 0x1c7   :  { %v236_v22 = vmul.f32 %v2175_v41, %v183_v2 }
 0x1cb   :  { %v351_v49 = vpop.permute.xlu1 %350 }
 0x1cc   :  { %v400_v60 = vmul.f32 %v2186_v46, %v351_v49 }
 0x1ce   :  { %v432_v25 = vadd.f32 %v400_v60, %v236_v22 }
 0x1d0   :  { %v628_v37 = vadd.f32 %v596_v21, %v432_v25  ;;  %v543_v50 = vpop.permute.xlu1 %542 }
 0x1d1   :  { %v595_v3 = vmul.f32 %v2193_v52, %v543_v50 }
 0x1d2   :  { %v824_v14 = vadd.f32 %v792_v28, %v628_v37 }
 0x1d3   :  { %v627_v11 = vadd.f32 %v595_v3, %v431_v33 }
 0x1d4   :  { %v860_v10 = vadd.f32 %v2687_v17, %v824_v14 }
 0x1d5   :  { %v823_v59 = vadd.f32 %v791_v43, %v627_v11  ;;  %v188_v62 = vpop.permute.xlu1 %187 }
 0x1d6   :  { %v892_v31 = vmax.f32 %v860_v10, 0.0  ;;  %v237_v8 = vmul.f32 %v2175_v41, %v188_v62 }
 0x1d7   :  { %v859_v58 = vadd.f32 %v2687_v17, %v823_v59 }
 0x1d9   :  { %v891_v54 = vmax.f32 %v859_v58, 0.0 }
 0x1da   :  { %v355_v27 = vpop.permute.xlu1 %354 }
 0x1db   :  { %1709 = vmatprep.mubr.msk.f32.mxu0 %vm906_vm0, %v891_v54  ;;  %v401_v24 = vmul.f32 %v2186_v46, %v355_v27 }
 0x1dc   :  { %1710 = vmatmul.mubr.msk.f32.gmra.mrb[26].mxu0 %vm906_vm0, %v892_v31 }
 0x1dd   :  { %v433_v57 = vadd.f32 %v401_v24, %v237_v8 }
 0x1df   :  { %v193_v34 = vpop.permute.xlu1 %192 }
 0x1e0   :  { %v238_v19 = vmul.f32 %v2175_v41, %v193_v34 }
 0x1e2   :  { %v2707_v5 = vpop.f32.mrb[0].mxu0 }
 0x1e3   :  { %v2709_v55 = vpop.f32.mrb[1].mxu0 }
 0x1e4   :  { %v359_v12 = vpop.permute.xlu1 %358 }
 0x1e5   :  { %v402_v56 = vmul.f32 %v2186_v46, %v359_v12 }
 0x1e6   :  { %v2714_v42 = vpop.f32.mrb[2].mxu0 }
 0x1e7   :  { %v434_v32 = vadd.f32 %v402_v56, %v238_v19  ;;  %v2717_v48 = vpop.f32.mrb[3].mxu0 }
 0x1e9   :  { %v630_v1 = vadd.f32 %v598_v30, %v434_v32  ;;  %v551_v4 = vpop.permute.xlu1 %550  ;;  %v563_v32 = vpop.permute.xlu0 %562 }
 0x1ea   :  { %v597_v44 = vmul.f32 %v2193_v52, %v551_v4  ;;  %v2723_v45 = vpop.f32.mrb[4].mxu0  ;;  %v600_v4 = vmul.f32 %v2193_v52, %v563_v32 }
 0x1eb   :  { %v826_v6 = vadd.f32 %v794_v13, %v630_v1  ;;  %v2725_v20 = vpop.f32.mrb[5].mxu0 }
 0x1ec   :  { %v629_v23 = vadd.f32 %v597_v44, %v433_v57 }
 0x1ed   :  { %v862_v39 = vadd.f32 %v2687_v17, %v826_v6 }
 0x1ee   :  { %v825_v15 = vadd.f32 %v793_v63, %v629_v23  ;;  %v198_v35 = vpop.permute.xlu1 %197  ;;  %v1681_v61 = vpop.f32.mrb[6].mxu0 }
 0x1ef   :  { %v1105_v36 = vadd.f32 %v1681_v61, %v2732_v9  ;;  %v1099_v40 = vpop.f32.mrb[7].mxu0  ;;  %v894_v51 = vmax.f32 %v862_v39, 0.0  ;;  %v239_v34 = vmul.f32 %v2175_v41, %v198_v35  ;;  %v1075_v35 = vadd.f32 %v2707_v5, %v2732_v9 }
 0x1f0   :  { %v861_v29 = vadd.f32 %v2687_v17, %v825_v15  ;;  %v1100_v2 = vadd.f32 %v2732_v9, %v1099_v40  ;;  %v1085_v40 = vadd.f32 %v2714_v42, %v2732_v9 }
 0x1f1   :  { %v1235_v22 = vmax.f32 %v1105_v36, 0.0  ;;  %v1080_v36 = vadd.f32 %v2732_v9, %v2717_v48 }
 0x1f2   :  { %v893_v47 = vmax.f32 %v861_v29, 0.0  ;;  %v1684_v49 = vpop.f32.mrb[8].mxu0  ;;  %v1234_v21 = vmax.f32 %v1100_v2, 0.0  ;;  %v1231_v5 = vmax.f32 %v1085_v40, 0.0  ;;  %v1095_v29 = vadd.f32 %v2723_v45, %v2732_v9 }
 0x1f3   :  { %v1115_v60 = vadd.f32 %v1684_v49, %v2732_v9  ;;  %v363_v0 = vpop.permute.xlu1 %362  ;;  %v1109_v25 = vpop.f32.mrb[9].mxu0 }
 0x1f4   :  { %v1110_v38 = vadd.f32 %v2732_v9, %v1109_v25  ;;  %1712 = vmatprep.mubr.msk.f32.mxu0 %vm906_vm0, %v893_v47  ;;  %1759 = vmatprep.mubr.f32.mxu1 %v1234_v21  ;;  %v403_v54 = vmul.f32 %v2186_v46, %v363_v0  ;;  %v1233_v42 = vmax.f32 %v1095_v29, 0.0 }
 0x1f5   :  { %1713 = vmatmul.mubr.msk.f32.gmra.mrb[28].mxu0 %vm906_vm0, %v894_v51  ;;  %1760 = vmatmul.mubr.f32.vlgmr.msra.gmra.mrb[0].mxu1 %v1235_v22  ;;  %v1237_v50 = vmax.f32 %v1115_v60, 0.0 }
 0x1f6   :  { %v1236_v28 = vmax.f32 %v1110_v38, 0.0  ;;  %v1687_v37 = vpop.f32.mrb[10].mxu0  ;;  %v435_v24 = vadd.f32 %v403_v54, %v239_v34 }
 0x1f7   :  { %v1125_v33 = vadd.f32 %v1687_v37, %v2732_v9  ;;  %v1119_v3 = vpop.f32.mrb[11].mxu0 }
 0x1f8   :  { %v1120_v14 = vadd.f32 %v2732_v9, %v1119_v3  ;;  %v203_v18 = vpop.permute.xlu1 %202  ;;  %1762 = vmatprep.mubr.f32.mxu1 %v1236_v28 }
 0x1f9   :  { %1763 = vmatmul.mubr.f32.gmra.mrb[2].mxu1 %v1237_v50  ;;  %v1239_v11 = vmax.f32 %v1125_v33, 0.0  ;;  %v240_v30 = vmul.f32 %v2175_v41, %v203_v18  ;;  %v1070_v41 = vadd.f32 %v2732_v9, %v2709_v55  ;;  %v1230_v55 = vmax.f32 %v1080_v36, 0.0 }
 0x1fa   :  { %v1238_v43 = vmax.f32 %v1120_v14, 0.0 }
 0x1fb   :  { %v1228_v61 = vmax.f32 %v1070_v41, 0.0 }
 0x1fc   :  { %1765 = vmatprep.mubr.f32.mxu1 %v1238_v43 }
 0x1fd   :  { %v367_v59 = vpop.permute.xlu1 %366  ;;  %1766 = vmatmul.mubr.f32.gmra.mrb[4].mxu1 %v1239_v11 }
 0x1fe   :  { %v404_v12 = vmul.f32 %v2186_v46, %v367_v59 }
 0x200   :  { %v1690_v62 = vpop.f32.mrb[12].mxu0  ;;  %v436_v26 = vadd.f32 %v404_v12, %v240_v30 }
 0x201   :  { %v1135_v10 = vadd.f32 %v1690_v62, %v2732_v9  ;;  %v1129_v58 = vpop.f32.mrb[13].mxu0 }
 0x202   :  { %v1130_v27 = vadd.f32 %v2732_v9, %v1129_v58  ;;  %v559_v31 = vpop.permute.xlu1 %558  ;;  %v632_v6 = vadd.f32 %v600_v4, %v436_v26 }
 0x203   :  { %v599_v56 = vmul.f32 %v2193_v52, %v559_v31  ;;  %v1241_v16 = vmax.f32 %v1135_v10, 0.0 }
 0x204   :  { %v1240_v19 = vmax.f32 %v1130_v27, 0.0 }
 0x205   :  { %v631_v13 = vadd.f32 %v599_v56, %v435_v24 }
 0x206   :  { %1768 = vmatprep.mubr.f32.mxu1 %v1240_v19 }
 0x207   :  { %v755_v8 = vpop.permute.xlu1 %754  ;;  %1769 = vmatmul.mubr.f32.gmra.mrb[6].mxu1 %v1241_v16 }
 0x208   :  { %v795_v1 = vmul.f32 %v2195_v53, %v755_v8 }
 0x20a   :  { %v827_v57 = vadd.f32 %v795_v1, %v631_v13 }
 0x20b   :  { %v759_v44 = vpop.permute.xlu1 %758 }
 0x20c   :  { %v863_v46 = vadd.f32 %v2687_v17, %v827_v57  ;;  %v796_v7 = vmul.f32 %v2195_v53, %v759_v44  ;;  %v1229_v53 = vmax.f32 %v1075_v35, 0.0  ;;  %v2787_v57 = vld [vmem:[%s2954_s1 + $0xb8] ss:$0 sm:$0xff] }
 0x20e   :  { %v895_v63 = vmax.f32 %v863_v46, 0.0  ;;  %v828_v23 = vadd.f32 %v796_v7, %v632_v6 }
 0x210   :  { %v864_v15 = vadd.f32 %v2687_v17, %v828_v23  ;;  %1715 = vmatprep.mubr.msk.f32.mxu0 %vm906_vm0, %v895_v63  ;;  %v1090_v17 = vadd.f32 %v2732_v9, %v2725_v20 }
 0x212   :  { %v896_v52 = vmax.f32 %v864_v15, 0.0  ;;  %v1232_v47 = vmax.f32 %v1090_v17, 0.0 }
 0x214   :  { %1716 = vmatmul.mubr.msk.f32.gmra.mrb[30].mxu0 %vm906_vm0, %v896_v52 }
 0x215   :  { %1750 = vmatprep.mubr.f32.mxu0 %v1228_v61 }
 0x218   :  { %1751 = vmatmul.mubr.f32.vlgmr.msra.gmra.mrb[32].mxu0 %v1229_v53 }
 0x219   :  { %v1693_v39 = vpop.f32.mrb[14].mxu0  ;;  %1753 = vmatprep.mubr.f32.mxu0 %v1230_v55 }
 0x21a   :  { %v1145_v48 = vadd.f32 %v1693_v39, %v2732_v9  ;;  %v1139_v2 = vpop.f32.mrb[15].mxu0 }
 0x21b   :  { %v1140_v49 = vadd.f32 %v2732_v9, %v1139_v2 }
 0x21c   :  { %1754 = vmatmul.mubr.f32.gmra.mrb[34].mxu0 %v1231_v5  ;;  %v1243_v22 = vmax.f32 %v1145_v48, 0.0 }
 0x21d   :  { %v1242_v21 = vmax.f32 %v1140_v49, 0.0  ;;  %1756 = vmatprep.mubr.f32.mxu0 %v1232_v47 }
 0x21f   :  { %1771 = vmatprep.mubr.f32.mxu1 %v1242_v21 }
 0x220   :  { %1757 = vmatmul.mubr.f32.gmra.mrb[36].mxu0 %v1233_v42  ;;  %1772 = vmatmul.mubr.f32.gmra.mrb[8].mxu1 %v1243_v22 }
 0x232   :  { %v1696_v20 = vpop.f32.mrb[16].mxu0 }
 0x233   :  { %v1155_v60 = vadd.f32 %v1696_v20, %v2732_v9  ;;  %v1149_v0 = vpop.f32.mrb[17].mxu0 }
 0x234   :  { %v1150_v45 = vadd.f32 %v2732_v9, %v1149_v0 }
 0x235   :  { %v1245_v51 = vmax.f32 %v1155_v60, 0.0 }
 0x236   :  { %v1244_v25 = vmax.f32 %v1150_v45, 0.0 }
 0x238   :  { %1774 = vmatprep.mubr.f32.mxu1 %v1244_v25 }
 0x239   :  { %1775 = vmatmul.mubr.f32.gmra.mrb[10].mxu1 %v1245_v51 }
 0x24b   :  { %v1699_v38 = vpop.f32.mrb[18].mxu0 }
 0x24c   :  { %v1165_v28 = vadd.f32 %v1699_v38, %v2732_v9  ;;  %v1159_v37 = vpop.f32.mrb[19].mxu0 }
 0x24d   :  { %v1160_v50 = vadd.f32 %v2732_v9, %v1159_v37 }
 0x24e   :  { %v1247_v3 = vmax.f32 %v1165_v28, 0.0 }
 0x24f   :  { %v1246_v33 = vmax.f32 %v1160_v50, 0.0 }
 0x251   :  { %1777 = vmatprep.mubr.f32.mxu1 %v1246_v33 }
 0x252   :  { %1778 = vmatmul.mubr.f32.gmra.mrb[12].mxu1 %v1247_v3 }
 0x264   :  { %v1702_v14 = vpop.f32.mrb[20].mxu0 }
 0x265   :  { %v1175_v18 = vadd.f32 %v1702_v14, %v2732_v9  ;;  %v1169_v43 = vpop.f32.mrb[21].mxu0 }
 0x266   :  { %v1170_v11 = vadd.f32 %v2732_v9, %v1169_v43 }
 0x267   :  { %v1249_v62 = vmax.f32 %v1175_v18, 0.0 }
 0x268   :  { %v1248_v59 = vmax.f32 %v1170_v11, 0.0 }
 0x26a   :  { %1780 = vmatprep.mubr.f32.mxu1 %v1248_v59 }
 0x26b   :  { %1781 = vmatmul.mubr.f32.gmra.mrb[14].mxu1 %v1249_v62 }
 0x27d   :  { %v1705_v10 = vpop.f32.mrb[22].mxu0 }
 0x27e   :  { %v1185_v58 = vadd.f32 %v1705_v10, %v2732_v9  ;;  %v1179_v54 = vpop.f32.mrb[23].mxu0 }
 0x27f   :  { %v1180_v27 = vadd.f32 %v2732_v9, %v1179_v54 }
 0x280   :  { %v1251_v34 = vmax.f32 %v1185_v58, 0.0 }
 0x281   :  { %v1250_v31 = vmax.f32 %v1180_v27, 0.0 }
 0x283   :  { %1783 = vmatprep.mubr.f32.mxu1 %v1250_v31 }
 0x284   :  { %1784 = vmatmul.mubr.f32.gmra.mrb[16].mxu1 %v1251_v34 }
 0x296   :  { %v1708_v12 = vpop.f32.mrb[24].mxu0 }
 0x297   :  { %v1195_v19 = vadd.f32 %v1708_v12, %v2732_v9  ;;  %v1189_v56 = vpop.f32.mrb[25].mxu0 }
 0x298   :  { %v1190_v16 = vadd.f32 %v2732_v9, %v1189_v56 }
 0x299   :  { %v1253_v30 = vmax.f32 %v1195_v19, 0.0 }
 0x29a   :  { %v1252_v24 = vmax.f32 %v1190_v16, 0.0 }
 0x29c   :  { %1786 = vmatprep.mubr.f32.mxu1 %v1252_v24 }
 0x29d   :  { %1787 = vmatmul.mubr.f32.gmra.mrb[18].mxu1 %v1253_v30 }
 0x2af   :  { %v1711_v32 = vpop.f32.mrb[26].mxu0 }
 0x2b0   :  { %v1205_v8 = vadd.f32 %v1711_v32, %v2732_v9  ;;  %v1199_v26 = vpop.f32.mrb[27].mxu0 }
 0x2b1   :  { %v1200_v13 = vadd.f32 %v2732_v9, %v1199_v26 }
 0x2b2   :  { %v1255_v4 = vmax.f32 %v1205_v8, 0.0 }
 0x2b3   :  { %v1254_v1 = vmax.f32 %v1200_v13, 0.0 }
 0x2b5   :  { %1789 = vmatprep.mubr.f32.mxu1 %v1254_v1 }
 0x2b6   :  { %1790 = vmatmul.mubr.f32.gmra.mrb[20].mxu1 %v1255_v4 }
 0x2c8   :  { %v1714_v44 = vpop.f32.mrb[28].mxu0  ;;  %v1761_v46 = vpop.f32.mrb[0].mxu1 }
 0x2c9   :  { %v1215_v6 = vadd.f32 %v1714_v44, %v2732_v9  ;;  %v1383_v7 = vadd.f32 %v1761_v46, %v2787_v57  ;;  %v1209_v63 = vpop.f32.mrb[29].mxu0  ;;  %v1377_v23 = vpop.f32.mrb[1].mxu1 }
 0x2ca   :  { %v1210_v41 = vadd.f32 %v2732_v9, %v1209_v63  ;;  %v1378_v15 = vadd.f32 %v2787_v57, %v1377_v23 }
 0x2cb   :  { %1514 = vst.msk [vmem:[%s2955_s2 + $0x38] sm:$0xff] %vm1506_vm1, %v1383_v7  ;;  %v1257_v61 = vmax.f32 %v1215_v6, 0.0 }
 0x2cc   :  { %v1256_v35 = vmax.f32 %v1210_v41, 0.0  ;;  %1513 = vst.msk [vmem:[%s2955_s2 + $0x30] sm:$0xff] %vm1506_vm1, %v1378_v15  ;;  %v1764_v52 = vpop.f32.mrb[2].mxu1 }
 0x2cd   :  { %v1393_v36 = vadd.f32 %v1764_v52, %v2787_v57  ;;  %v1387_v53 = vpop.f32.mrb[3].mxu1 }
 0x2ce   :  { %v1388_v40 = vadd.f32 %v2787_v57, %v1387_v53  ;;  %1792 = vmatprep.mubr.f32.mxu1 %v1256_v35 }
 0x2cf   :  { %1516 = vst.msk [vmem:[%s2955_s2 + $0x48] sm:$0xff] %vm1506_vm1, %v1393_v36  ;;  %1793 = vmatmul.mubr.f32.gmra.mrb[22].mxu1 %v1257_v61 }
 0x2d0   :  { %1515 = vst.msk [vmem:[%s2955_s2 + $0x40] sm:$0xff] %vm1506_vm1, %v1388_v40  ;;  %v1767_v55 = vpop.f32.mrb[4].mxu1 }
 0x2d1   :  { %v1403_v17 = vadd.f32 %v1767_v55, %v2787_v57  ;;  %v1397_v39 = vpop.f32.mrb[5].mxu1 }
 0x2d2   :  { %v1398_v5 = vadd.f32 %v2787_v57, %v1397_v39 }
 0x2d3   :  { %1518 = vst.msk [vmem:[%s2955_s2 + $0x58] sm:$0xff] %vm1506_vm1, %v1403_v17 }
 0x2d4   :  { %1517 = vst.msk [vmem:[%s2955_s2 + $0x50] sm:$0xff] %vm1506_vm1, %v1398_v5 }
 0x2da   :  { %v1770_v29 = vpop.f32.mrb[6].mxu1 }
 0x2db   :  { %v1413_v48 = vadd.f32 %v1770_v29, %v2787_v57  ;;  %v1407_v2 = vpop.f32.mrb[7].mxu1 }
 0x2dc   :  { %v1408_v47 = vadd.f32 %v2787_v57, %v1407_v2 }
 0x2dd   :  { %1520 = vst.msk [vmem:[%s2955_s2 + $0x68] sm:$0xff] %vm1506_vm1, %v1413_v48 }
 0x2de   :  { %1519 = vst.msk [vmem:[%s2955_s2 + $0x60] sm:$0xff] %vm1506_vm1, %v1408_v47 }
 0x2e7   :  { %v1717_v49 = vpop.f32.mrb[30].mxu0 }
 0x2e8   :  { %v1225_v21 = vadd.f32 %v1717_v49, %v2732_v9  ;;  %v1219_v42 = vpop.f32.mrb[31].mxu0 }
 0x2e9   :  { %v1220_v22 = vadd.f32 %v2732_v9, %v1219_v42 }
 0x2ea   :  { %v1259_v0 = vmax.f32 %v1225_v21, 0.0 }
 0x2eb   :  { %v1258_v20 = vmax.f32 %v1220_v22, 0.0  ;;  %v1752_v60 = vpop.f32.mrb[32].mxu0 }
 0x2ec   :  { %v1353_v45 = vadd.f32 %v1752_v60, %v2787_v57  ;;  %v1347_v25 = vpop.f32.mrb[33].mxu0 }
 0x2ed   :  { %v1348_v51 = vadd.f32 %v2787_v57, %v1347_v25  ;;  %1795 = vmatprep.mubr.f32.mxu1 %v1258_v20 }
 0x2ee   :  { %1508 = vst.msk [vmem:[%s2955_s2 + $0x8] sm:$0xff] %vm1506_vm1, %v1353_v45  ;;  %1796 = vmatmul.mubr.f32.gmra.mrb[24].mxu1 %v1259_v0 }
 0x2ef   :  { %1507 = vst.msk [vmem:[%s2955_s2] sm:$0xff] %vm1506_vm1, %v1348_v51  ;;  %v1755_v9 = vpop.f32.mrb[34].mxu0 }
 0x2f0   :  { %v1363_v38 = vadd.f32 %v1755_v9, %v2787_v57  ;;  %v1357_v28 = vpop.f32.mrb[35].mxu0 }
 0x2f1   :  { %v1358_v37 = vadd.f32 %v2787_v57, %v1357_v28 }
 0x2f2   :  { %1510 = vst.msk [vmem:[%s2955_s2 + $0x18] sm:$0xff] %vm1506_vm1, %v1363_v38 }
 0x2f3   :  { %1509 = vst.msk [vmem:[%s2955_s2 + $0x10] sm:$0xff] %vm1506_vm1, %v1358_v37  ;;  %v1758_v50 = vpop.f32.mrb[36].mxu0  ;;  %v1773_v33 = vpop.f32.mrb[8].mxu1 }
 0x2f4   :  { %v1373_v3 = vadd.f32 %v1758_v50, %v2787_v57  ;;  %v1423_v14 = vadd.f32 %v1773_v33, %v2787_v57  ;;  %v1367_v18 = vpop.f32.mrb[37].mxu0  ;;  %v1417_v43 = vpop.f32.mrb[9].mxu1 }
 0x2f5   :  { %v1368_v11 = vadd.f32 %v2787_v57, %v1367_v18  ;;  %v1418_v59 = vadd.f32 %v2787_v57, %v1417_v43 }
 0x2f6   :  { %1512 = vst.msk [vmem:[%s2955_s2 + $0x28] sm:$0xff] %vm1506_vm1, %v1373_v3  ;;  %1522 = vst.msk [vmem:[%s2955_s2 + $0x78] sm:$0xff] %vm1506_vm1, %v1423_v14 }
 0x2f7   :  { %1511 = vst.msk [vmem:[%s2955_s2 + $0x20] sm:$0xff] %vm1506_vm1, %v1368_v11  ;;  %1521 = vst.msk [vmem:[%s2955_s2 + $0x70] sm:$0xff] %vm1506_vm1, %v1418_v59 }
 0x30c   :  { %v1776_v62 = vpop.f32.mrb[10].mxu1 }
 0x30d   :  { %v1433_v10 = vadd.f32 %v1776_v62, %v2787_v57  ;;  %v1427_v58 = vpop.f32.mrb[11].mxu1 }
 0x30e   :  { %v1428_v54 = vadd.f32 %v2787_v57, %v1427_v58 }
 0x30f   :  { %1524 = vst.msk [vmem:[%s2955_s2 + $0x88] sm:$0xff] %vm1506_vm1, %v1433_v10 }
 0x310   :  { %1523 = vst.msk [vmem:[%s2955_s2 + $0x80] sm:$0xff] %vm1506_vm1, %v1428_v54 }
 0x325   :  { %v1779_v27 = vpop.f32.mrb[12].mxu1 }
 0x326   :  { %v1443_v31 = vadd.f32 %v1779_v27, %v2787_v57  ;;  %v1437_v34 = vpop.f32.mrb[13].mxu1 }
 0x327   :  { %v1438_v12 = vadd.f32 %v2787_v57, %v1437_v34 }
 0x328   :  { %1526 = vst.msk [vmem:[%s2955_s2 + $0x98] sm:$0xff] %vm1506_vm1, %v1443_v31 }
 0x329   :  { %1525 = vst.msk [vmem:[%s2955_s2 + $0x90] sm:$0xff] %vm1506_vm1, %v1438_v12 }
 0x33e   :  { %v1782_v19 = vpop.f32.mrb[14].mxu1 }
 0x33f   :  { %v1453_v56 = vadd.f32 %v1782_v19, %v2787_v57  ;;  %v1447_v16 = vpop.f32.mrb[15].mxu1 }
 0x340   :  { %v1448_v24 = vadd.f32 %v2787_v57, %v1447_v16 }
 0x341   :  { %1528 = vst.msk [vmem:[%s2955_s2 + $0xa8] sm:$0xff] %vm1506_vm1, %v1453_v56 }
 0x342   :  { %1527 = vst.msk [vmem:[%s2955_s2 + $0xa0] sm:$0xff] %vm1506_vm1, %v1448_v24 }
 0x357   :  { %v1785_v30 = vpop.f32.mrb[16].mxu1 }
 0x358   :  { %v1463_v32 = vadd.f32 %v1785_v30, %v2787_v57  ;;  %v1457_v8 = vpop.f32.mrb[17].mxu1 }
 0x359   :  { %v1458_v26 = vadd.f32 %v2787_v57, %v1457_v8 }
 0x35a   :  { %1530 = vst.msk [vmem:[%s2955_s2 + $0xb8] sm:$0xff] %vm1506_vm1, %v1463_v32 }
 0x35b   :  { %1529 = vst.msk [vmem:[%s2955_s2 + $0xb0] sm:$0xff] %vm1506_vm1, %v1458_v26 }
 0x370   :  { %v1788_v13 = vpop.f32.mrb[18].mxu1 }
 0x371   :  { %v1473_v1 = vadd.f32 %v1788_v13, %v2787_v57  ;;  %v1467_v4 = vpop.f32.mrb[19].mxu1 }
 0x372   :  { %v1468_v44 = vadd.f32 %v2787_v57, %v1467_v4 }
 0x373   :  { %1532 = vst.msk [vmem:[%s2955_s2 + $0xc8] sm:$0xff] %vm1506_vm1, %v1473_v1 }
 0x374   :  { %1531 = vst.msk [vmem:[%s2955_s2 + $0xc0] sm:$0xff] %vm1506_vm1, %v1468_v44 }
 0x389   :  { %v1791_v46 = vpop.f32.mrb[20].mxu1 }
 0x38a   :  { %v1483_v6 = vadd.f32 %v1791_v46, %v2787_v57  ;;  %v1477_v7 = vpop.f32.mrb[21].mxu1 }
 0x38b   :  { %v1478_v63 = vadd.f32 %v2787_v57, %v1477_v7 }
 0x38c   :  { %1534 = vst.msk [vmem:[%s2955_s2 + $0xd8] sm:$0xff] %vm1506_vm1, %v1483_v6 }
 0x38d   :  { %1533 = vst.msk [vmem:[%s2955_s2 + $0xd0] sm:$0xff] %vm1506_vm1, %v1478_v63 }
 0x3a2   :  { %v1794_v23 = vpop.f32.mrb[22].mxu1 }
 0x3a3   :  { %v1493_v41 = vadd.f32 %v1794_v23, %v2787_v57  ;;  %v1487_v15 = vpop.f32.mrb[23].mxu1 }
 0x3a4   :  { %v1488_v35 = vadd.f32 %v2787_v57, %v1487_v15 }
 0x3a5   :  { %1536 = vst.msk [vmem:[%s2955_s2 + $0xe8] sm:$0xff] %vm1506_vm1, %v1493_v41 }
 0x3a6   :  { %1535 = vst.msk [vmem:[%s2955_s2 + $0xe0] sm:$0xff] %vm1506_vm1, %v1488_v35 }
 0x3c1   :  { %v1797_v52 = vpop.f32.mrb[24].mxu1 }
 0x3c2   :  { %v1503_v61 = vadd.f32 %v1797_v52, %v2787_v57  ;;  %v1497_v36 = vpop.f32.mrb[25].mxu1 }
 0x3c3   :  { %v1498_v53 = vadd.f32 %v2787_v57, %v1497_v36 }
 0x3c4   :  { %1538 = vst.msk [vmem:[%s2955_s2 + $0xf8] sm:$0xff] %vm1506_vm1, %v1503_v61 }
 0x3c5   :  { %1537 = vst.msk [vmem:[%s2955_s2 + $0xf0] sm:$0xff] %vm1506_vm1, %v1498_v53 }

</bundles_post_ra>
